<compile_context>
chip_gen: v5e
topology: v5e:2x2
jax: 0.10.0
libtpu: 0.0.40
codegen_flags: <defaults>
</compile_context>

<pallas_src>
import math
from functools import partial

import jax
import jax.numpy as jnp
from jax import lax
from jax.experimental import pallas as pl
from jax.experimental.pallas import tpu as pltpu


def make_ntm_kernel(T, NL, NH, B, L, C, H, Din, Dout):
    """Builds the per-timestep NTM kernel (static unroll over layers / heads)."""
    Rout = C + 6           # key(C) + beta + gate + shift(3) + gamma
    Wout = 3 * C + 6       # + erase(C) + add(C)
    n_rw = NH * Rout
    n_ww = NH * Wout

    def kernel(*refs):
        i = 0
        xproj_ref = refs[i]; i += 1            # (T, B, 4H)  x @ W_x + b0 (hoisted)
        read_seed_ref = refs[i]; i += 1        # (NH, 1, C)
        s1_ref = refs[i]; i += 1               # (NL, 1, H)  LSTM h seed
        s2_ref = refs[i]; i += 1               # (NL, 1, H)  LSTM c seed
        mem_seed_ref = refs[i]; i += 1         # (L, C)
        wih_refs = refs[i:i + NL - 1]; i += NL - 1   # layers 1.. : (H, 4H)
        whh_refs = refs[i:i + NL]; i += NL           # per-layer (H, 4H)
        b_refs = refs[i:i + NL - 1]; i += NL - 1     # layers 1.. : (1, 4H)
        wread_ref = refs[i]; i += 1            # (NH, C, 4H)  recurrent read proj
        wctrl_ref = refs[i]; i += 1            # (H, NH*Rout + NH*Wout + Dout)
        bctrl_ref = refs[i]; i += 1            # (1, NH*Rout + NH*Wout + Dout)
        owread_ref = refs[i]; i += 1           # (NH, C, Dout)
        y_ref = refs[i]; i += 1                # (T, B, Dout) VMEM-resident output
        h_ref, c_ref, mem_ref, read_ref, rws_ref, wws_ref = refs[i:i + 6]

        t = pl.program_id(0)

        @pl.when(t == 0)
        def _init():
            # reset(batch_size) semantics
            h_ref[...] = jnp.broadcast_to(s1_ref[...], (NL, B, H))
            c_ref[...] = jnp.broadcast_to(s2_ref[...], (NL, B, H))
            mem_ref[...] = jnp.broadcast_to(mem_seed_ref[...][None, :, :], (B, L, C))
            read_ref[...] = jnp.broadcast_to(read_seed_ref[...], (NH, B, C))
            rws_ref[...] = jnp.zeros_like(rws_ref)
            wws_ref[...] = jnp.zeros_like(wws_ref)

        # ---- multi-layer LSTM single step (PyTorch gate order i, f, g, o) ----
        gates0 = xproj_ref[t]                               # (B, 4H), bias folded in
        for hh in range(NH):
            gates0 = gates0 + jnp.dot(read_ref[hh], wread_ref[hh],
                                      preferred_element_type=jnp.float32)
        layer_in = None
        for l in range(NL):
            h_prev = h_ref[l]
            c_prev = c_ref[l]
            if l == 0:
                g = gates0 + jnp.dot(h_prev, whh_refs[0][...],
                                     preferred_element_type=jnp.float32)
            else:
                g = (jnp.dot(layer_in, wih_refs[l - 1][...],
                             preferred_element_type=jnp.float32)
                     + jnp.dot(h_prev, whh_refs[l][...],
                               preferred_element_type=jnp.float32)
                     + b_refs[l - 1][...])
            i_g = jax.nn.sigmoid(g[:, 0:H])
            f_g = jax.nn.sigmoid(g[:, H:2 * H])
            g_g = jnp.tanh(g[:, 2 * H:3 * H])
            o_g = jax.nn.sigmoid(g[:, 3 * H:4 * H])
            c_new = f_g * c_prev + i_g * g_g
            h_new = o_g * jnp.tanh(c_new)
            h_ref[l] = h_new
            c_ref[l] = c_new
            layer_in = h_new
        control = layer_in                                   # (B, H)

        # ---- ONE fused matmul for all head params + output control term ----
        P = (jnp.dot(control, wctrl_ref[...], preferred_element_type=jnp.float32)
             + bctrl_ref[...])

        def softmax_lanes(z):
            e = jnp.exp(z - jnp.max(z, axis=1, keepdims=True))
            return e * pl.reciprocal(jnp.sum(e, axis=1, keepdims=True), approx=True)

        def address(key, beta, gate, shift, gamma, prev_w):
            mem = mem_ref[...]                               # (B, L, C)
            mk = mem + 1e-16
            kk = key + 1e-16                                 # (B, C)
            # cosine similarity along channel dim (norms via rsqrt, not divide)
            dot = jnp.sum(mk * kk[:, None, :], axis=-1)              # (B, L)
            nm2 = jnp.sum(mk * mk, axis=-1)                          # (B, L)
            nk2 = jnp.sum(kk * kk, axis=-1)[:, None]                 # (B, 1)
            cos = dot * (lax.rsqrt(jnp.maximum(nm2, 1e-16))
                         * lax.rsqrt(jnp.maximum(nk2, 1e-16)))
            w_c = softmax_lanes(beta * cos)                          # content
            w_g = gate * w_c + (1.0 - gate) * prev_w                 # interpolate
            # circular convolution with 3-tap shift kernel (cross-correlation,
            # matching torch.conv1d on [w[-1], w, w[0]])
            padded = jnp.concatenate([w_g[:, L - 1:L], w_g, w_g[:, 0:1]], axis=1)
            w_s = (padded[:, 0:L] * shift[:, 0:1]
                   + padded[:, 1:L + 1] * shift[:, 1:2]
                   + padded[:, 2:L + 2] * shift[:, 2:3])
            # sharpen: w**gamma / (sum + eps); log guarded against exact zeros
            w_pow = jnp.exp(gamma * jnp.log(jnp.maximum(w_s, 1e-30)))
            return w_pow * pl.reciprocal(
                jnp.sum(w_pow, axis=1, keepdims=True) + 1e-16, approx=True)

        def head_params(p):
            key = p[:, 0:C]
            beta = jax.nn.softplus(p[:, C:C + 1])
            gate = jax.nn.sigmoid(p[:, C + 1:C + 2])
            shift = softmax_lanes(p[:, C + 2:C + 5])
            gamma = 1.0 + jax.nn.softplus(p[:, C + 5:C + 6])
            return key, beta, gate, shift, gamma

        y = P[:, n_rw + n_ww:]                 # (B, Dout), output bias folded in
        # TODO(synk): for NH > 1 the read-head addressing could be batched over
        # the head axis (fold heads into the sublane/batch axis) instead of
        # this statically unrolled loop.
        for hh in range(NH):
            # ---- reader head ----
            p = P[:, hh * Rout:(hh + 1) * Rout]
            w_r = address(*head_params(p), rws_ref[hh])
            rws_ref[hh] = w_r
            data = jnp.sum(w_r[:, :, None] * mem_ref[...], axis=1)   # (B, C)
            read_ref[hh] = data
            y = y + jnp.dot(data, owread_ref[hh], preferred_element_type=jnp.float32)
            # ---- writer head ----
            q = P[:, n_rw + hh * Wout:n_rw + (hh + 1) * Wout]
            w_w = address(*head_params(q), wws_ref[hh])
            wws_ref[hh] = w_w
            erase = jax.nn.sigmoid(q[:, C + 6:2 * C + 6])             # (B, C)
            add = q[:, 2 * C + 6:3 * C + 6]                           # (B, C)
            mem_ref[...] = (mem_ref[...] * (1.0 - w_w[:, :, None] * erase[:, None, :])
                            + w_w[:, :, None] * add[:, None, :])

        y_ref[t] = jax.nn.sigmoid(y).astype(y_ref.dtype)

    return kernel


def ntm_forward(x, params, *, NL, NH, B, L, C, H, Din, Dout):
    T = x.shape[0]

    # ---- hoist the non-recurrent input projection out of the kernel ----
    wih0 = params["wih"][0]                                  # (Din + NH*C, 4H)
    W_x = wih0[:Din]                                         # (Din, 4H)
    W_read = wih0[Din:].reshape(NH, C, 4 * H)                # per-head recurrent part
    xproj = (jnp.dot(x.reshape(T * B, Din), W_x,
                     preferred_element_type=jnp.float32).reshape(T, B, 4 * H)
             + params["b"][0])                               # fold layer-0 bias

    # ---- fuse all control-sourced projections into one weight / bias ----
    W_ctrl = jnp.concatenate([params["rW"][h] for h in range(NH)]
                             + [params["wW"][h] for h in range(NH)]
                             + [params["oW"][:H]], axis=1)
    b_ctrl = jnp.concatenate([params["rb"][h] for h in range(NH)]
                             + [params["wb"][h] for h in range(NH)]
                             + [params["ob"]], axis=1)
    oW_read = params["oW"][H:].reshape(NH, C, Dout)

    inputs = ([xproj, params["read_seed"], params["s1"], params["s2"], params["mem_seed"]]
              + list(params["wih"][1:]) + list(params["whh"]) + list(params["b"][1:])
              + [W_read, W_ctrl, b_ctrl, oW_read])

    def full_spec(a):
        return pl.BlockSpec(a.shape, lambda t, _n=a.ndim: (0,) * _n)

    # Every input (including the pre-projected sequence) is fully VMEM-resident
    # with a constant index_map -> DMA'd once, no per-timestep micro-DMAs.
    in_specs = [full_spec(a) for a in inputs]
    # Output stays VMEM-resident across the whole sequential grid and is
    # written back to HBM once at the end.
    out_specs = pl.BlockSpec((T, B, Dout), lambda t: (0, 0, 0))

    kernel = make_ntm_kernel(T, NL, NH, B, L, C, H, Din, Dout)

    return pl.pallas_call(
        kernel,
        out_shape=jax.ShapeDtypeStruct((T, B, Dout), jnp.float32),
        grid_spec=pltpu.PrefetchScalarGridSpec(
            num_scalar_prefetch=0,
            grid=(T,),
            in_specs=in_specs,
            out_specs=out_specs,
            scratch_shapes=[
                pltpu.VMEM((NL, B, H), jnp.float32),   # LSTM hidden state
                pltpu.VMEM((NL, B, H), jnp.float32),   # LSTM cell state
                pltpu.VMEM((B, L, C), jnp.float32),    # NTM memory matrix
                pltpu.VMEM((NH, B, C), jnp.float32),   # previous read vectors
                pltpu.VMEM((NH, B, L), jnp.float32),   # reader address weights
                pltpu.VMEM((NH, B, L), jnp.float32),   # writer address weights
            ],
        ),
        compiler_params=pltpu.CompilerParams(dimension_semantics=("arbitrary",)),
    )(*inputs)


if __name__ == "__main__":
    # Small shapes consistent with the module's forward.
    T, B = 8, 2
    Din, Dout = 8, 8
    NH, H, NL = 1, 32, 1
    L, C = 16, 16
    ctrl_in = Din + NH * C
    Rout = C + 6            # key(C) + beta + gate + shift(3) + gamma
    Wout = 3 * C + 6        # + erase(C) + add(C)

    keys = iter(jax.random.split(jax.random.PRNGKey(0), 32))

    def nxt():
        return next(keys)

    # ---- deterministic parameter init (mirrors __init__ distributions) ----
    lstm_std = 5.0 / math.sqrt(ctrl_in + H)
    wih, whh, bias = [], [], []
    for l in range(NL):
        in_sz = ctrl_in if l == 0 else H
        wih.append(jax.random.uniform(nxt(), (in_sz, 4 * H), jnp.float32, -lstm_std, lstm_std))
        whh.append(jax.random.uniform(nxt(), (H, 4 * H), jnp.float32, -lstm_std, lstm_std))
        bias.append(jnp.zeros((1, 4 * H), jnp.float32))   # constant_(b, 0)

    s1 = jax.random.normal(nxt(), (NL, 1, H), jnp.float32) * 0.05
    s2 = jax.random.normal(nxt(), (NL, 1, H), jnp.float32) * 0.05

    mem_std = 1.0 / math.sqrt(L + C)
    mem_seed = jax.random.uniform(nxt(), (L, C), jnp.float32, -mem_std, mem_std)

    read_seed = jax.random.normal(nxt(), (NH, 1, C), jnp.float32) * 0.01

    a_r = 1.4 * math.sqrt(6.0 / (H + Rout))
    rW = jax.random.uniform(nxt(), (NH, H, Rout), jnp.float32, -a_r, a_r)
    rb = jax.random.normal(nxt(), (NH, 1, Rout), jnp.float32) * 0.01

    a_w = 1.4 * math.sqrt(6.0 / (H + Wout))
    wW = jax.random.uniform(nxt(), (NH, H, Wout), jnp.float32, -a_w, a_w)
    wb = jax.random.normal(nxt(), (NH, 1, Wout), jnp.float32) * 0.01

    a_o = math.sqrt(6.0 / (H + NH * C + Dout))
    oW = jax.random.uniform(nxt(), (H + NH * C, Dout), jnp.float32, -a_o, a_o)
    ob = jax.random.normal(nxt(), (1, Dout), jnp.float32) * 0.01

    params = dict(read_seed=read_seed, s1=s1, s2=s2, mem_seed=mem_seed,
                  wih=wih, whh=whh, b=bias, rW=rW, rb=rb, wW=wW, wb=wb,
                  oW=oW, ob=ob)

    x = jax.random.normal(nxt(), (T, B, Din), jnp.float32)

    fwd = jax.jit(ntm_forward,
                  static_argnames=("NL", "NH", "B", "L", "C", "H", "Din", "Dout"))
    out = fwd(x, params, NL=NL, NH=NH, B=B, L=L, C=C, H=H, Din=Din, Dout=Dout)
    out = jax.block_until_ready(out)
    assert out.shape == (T, B, Dout)
    assert bool(jnp.all(jnp.isfinite(out)))
    print("KERNEL_OK")
</pallas_src>

<mosaic_0001>
module attributes {stable_mosaic.version = 11 : i64} {
  func.func @kernel(%arg0: i32, %arg1: memref<8x2x128xf32, #tpu.memory_space<vmem>>, %arg2: memref<1x1x16xf32, #tpu.memory_space<vmem>>, %arg3: memref<1x1x32xf32, #tpu.memory_space<vmem>>, %arg4: memref<1x1x32xf32, #tpu.memory_space<vmem>>, %arg5: memref<16x16xf32, #tpu.memory_space<vmem>>, %arg6: memref<32x128xf32, #tpu.memory_space<vmem>>, %arg7: memref<1x16x128xf32, #tpu.memory_space<vmem>>, %arg8: memref<32x84xf32, #tpu.memory_space<vmem>>, %arg9: memref<1x84xf32, #tpu.memory_space<vmem>>, %arg10: memref<1x16x8xf32, #tpu.memory_space<vmem>>, %arg11: memref<8x2x8xf32, #tpu.memory_space<vmem>>, %arg12: memref<1x2x32xf32, #tpu.memory_space<vmem>>, %arg13: memref<1x2x32xf32, #tpu.memory_space<vmem>>, %arg14: memref<2x16x16xf32, #tpu.memory_space<vmem>>, %arg15: memref<1x2x16xf32, #tpu.memory_space<vmem>>, %arg16: memref<1x2x16xf32, #tpu.memory_space<vmem>>, %arg17: memref<1x2x16xf32, #tpu.memory_space<vmem>>) attributes {dimension_semantics = [#tpu.dimension_semantics<arbitrary>], iteration_bounds = array<i64: 8>, scalar_prefetch = 0 : i64, scratch_operands = 6 : i64, tpu.core_type = #tpu.core_type<tc>, window_params = [{pipeline_mode = #tpu.pipeline_mode<synchronous>, transform_indices = @transform_0, window_bounds = array<i64: 8, 2, 128>}, {pipeline_mode = #tpu.pipeline_mode<synchronous>, transform_indices = @transform_1, window_bounds = array<i64: 1, 1, 16>}, {pipeline_mode = #tpu.pipeline_mode<synchronous>, transform_indices = @transform_2, window_bounds = array<i64: 1, 1, 32>}, {pipeline_mode = #tpu.pipeline_mode<synchronous>, transform_indices = @transform_3, window_bounds = array<i64: 1, 1, 32>}, {pipeline_mode = #tpu.pipeline_mode<synchronous>, transform_indices = @transform_4, window_bounds = array<i64: 16, 16>}, {pipeline_mode = #tpu.pipeline_mode<synchronous>, transform_indices = @transform_5, window_bounds = array<i64: 32, 128>}, {pipeline_mode = #tpu.pipeline_mode<synchronous>, transform_indices = @transform_6, window_bounds = array<i64: 1, 16, 128>}, {pipeline_mode = #tpu.pipeline_mode<synchronous>, transform_indices = @transform_7, window_bounds = array<i64: 32, 84>}, {pipeline_mode = #tpu.pipeline_mode<synchronous>, transform_indices = @transform_8, window_bounds = array<i64: 1, 84>}, {pipeline_mode = #tpu.pipeline_mode<synchronous>, transform_indices = @transform_9, window_bounds = array<i64: 1, 16, 8>}, {pipeline_mode = #tpu.pipeline_mode<synchronous>, transform_indices = @transform_10, window_bounds = array<i64: 8, 2, 8>}]} {
    %c0_i32 = arith.constant 0 : i32
    %0 = arith.cmpi eq, %arg0, %c0_i32 : i32
    %1 = arith.extui %0 : i1 to i32
    %c0_i32_0 = arith.constant 0 : i32
    %2 = arith.cmpi ne, %1, %c0_i32_0 : i32
    scf.if %2 {
      %c0_113 = arith.constant 0 : index
      %c0_114 = arith.constant 0 : index
      %c0_115 = arith.constant 0 : index
      %356 = vector.load %arg3[%c0_113, %c0_114, %c0_115] : memref<1x1x32xf32, #tpu.memory_space<vmem>>, vector<1x1x32xf32>
      %357 = vector.shape_cast %356 : vector<1x1x32xf32> to vector<1x1x32xf32>
      %358 = vector.broadcast %357 : vector<1x1x32xf32> to vector<1x2x32xf32>
      %c0_116 = arith.constant 0 : index
      %c0_117 = arith.constant 0 : index
      %c0_118 = arith.constant 0 : index
      %359 = vector.load %arg12[%c0_116, %c0_117, %c0_118] : memref<1x2x32xf32, #tpu.memory_space<vmem>>, vector<1x2x32xf32>
      tpu.vector_store %arg12[%c0_116, %c0_117, %c0_118], %358 {strides = array<i32>} : memref<1x2x32xf32, #tpu.memory_space<vmem>>, vector<1x2x32xf32>,
      %c0_119 = arith.constant 0 : index
      %c0_120 = arith.constant 0 : index
      %c0_121 = arith.constant 0 : index
      %360 = vector.load %arg4[%c0_119, %c0_120, %c0_121] : memref<1x1x32xf32, #tpu.memory_space<vmem>>, vector<1x1x32xf32>
      %361 = vector.shape_cast %360 : vector<1x1x32xf32> to vector<1x1x32xf32>
      %362 = vector.broadcast %361 : vector<1x1x32xf32> to vector<1x2x32xf32>
      %c0_122 = arith.constant 0 : index
      %c0_123 = arith.constant 0 : index
      %c0_124 = arith.constant 0 : index
      %363 = vector.load %arg13[%c0_122, %c0_123, %c0_124] : memref<1x2x32xf32, #tpu.memory_space<vmem>>, vector<1x2x32xf32>
      tpu.vector_store %arg13[%c0_122, %c0_123, %c0_124], %362 {strides = array<i32>} : memref<1x2x32xf32, #tpu.memory_space<vmem>>, vector<1x2x32xf32>,
      %c0_125 = arith.constant 0 : index
      %c0_126 = arith.constant 0 : index
      %364 = vector.load %arg5[%c0_125, %c0_126] : memref<16x16xf32, #tpu.memory_space<vmem>>, vector<16x16xf32>
      %365 = vector.shape_cast %364 : vector<16x16xf32> to vector<1x16x16xf32>
      %366 = vector.shape_cast %365 : vector<1x16x16xf32> to vector<1x16x16xf32>
      %367 = vector.broadcast %366 : vector<1x16x16xf32> to vector<2x16x16xf32>
      %c0_127 = arith.constant 0 : index
      %c0_128 = arith.constant 0 : index
      %c0_129 = arith.constant 0 : index
      %368 = vector.load %arg14[%c0_127, %c0_128, %c0_129] : memref<2x16x16xf32, #tpu.memory_space<vmem>>, vector<2x16x16xf32>
      tpu.vector_store %arg14[%c0_127, %c0_128, %c0_129], %367 {strides = array<i32>} : memref<2x16x16xf32, #tpu.memory_space<vmem>>, vector<2x16x16xf32>,
      %c0_130 = arith.constant 0 : index
      %c0_131 = arith.constant 0 : index
      %c0_132 = arith.constant 0 : index
      %369 = vector.load %arg2[%c0_130, %c0_131, %c0_132] : memref<1x1x16xf32, #tpu.memory_space<vmem>>, vector<1x1x16xf32>
      %370 = vector.shape_cast %369 : vector<1x1x16xf32> to vector<1x1x16xf32>
      %371 = vector.broadcast %370 : vector<1x1x16xf32> to vector<1x2x16xf32>
      %c0_133 = arith.constant 0 : index
      %c0_134 = arith.constant 0 : index
      %c0_135 = arith.constant 0 : index
      %372 = vector.load %arg15[%c0_133, %c0_134, %c0_135] : memref<1x2x16xf32, #tpu.memory_space<vmem>>, vector<1x2x16xf32>
      tpu.vector_store %arg15[%c0_133, %c0_134, %c0_135], %371 {strides = array<i32>} : memref<1x2x16xf32, #tpu.memory_space<vmem>>, vector<1x2x16xf32>,
      %cst_136 = arith.constant 0.000000e+00 : f32
      %373 = vector.broadcast %cst_136 : f32 to vector<1x2x16xf32>
      %c0_137 = arith.constant 0 : index
      %c0_138 = arith.constant 0 : index
      %c0_139 = arith.constant 0 : index
      %374 = vector.load %arg16[%c0_137, %c0_138, %c0_139] : memref<1x2x16xf32, #tpu.memory_space<vmem>>, vector<1x2x16xf32>
      tpu.vector_store %arg16[%c0_137, %c0_138, %c0_139], %373 {strides = array<i32>} : memref<1x2x16xf32, #tpu.memory_space<vmem>>, vector<1x2x16xf32>,
      %cst_140 = arith.constant 0.000000e+00 : f32
      %375 = vector.broadcast %cst_140 : f32 to vector<1x2x16xf32>
      %c0_141 = arith.constant 0 : index
      %c0_142 = arith.constant 0 : index
      %c0_143 = arith.constant 0 : index
      %376 = vector.load %arg17[%c0_141, %c0_142, %c0_143] : memref<1x2x16xf32, #tpu.memory_space<vmem>>, vector<1x2x16xf32>
      tpu.vector_store %arg17[%c0_141, %c0_142, %c0_143], %375 {strides = array<i32>} : memref<1x2x16xf32, #tpu.memory_space<vmem>>, vector<1x2x16xf32>,
    } else {
    }
    %3 = arith.index_cast %arg0 : i32 to index
    %c0 = arith.constant 0 : index
    %c0_1 = arith.constant 0 : index
    %4 = vector.load %arg1[%3, %c0, %c0_1] : memref<8x2x128xf32, #tpu.memory_space<vmem>>, vector<1x2x128xf32>
    %5 = vector.shape_cast %4 : vector<1x2x128xf32> to vector<2x128xf32>
    %c0_2 = arith.constant 0 : index
    %c0_3 = arith.constant 0 : index
    %c0_4 = arith.constant 0 : index
    %6 = vector.load %arg15[%c0_2, %c0_3, %c0_4] : memref<1x2x16xf32, #tpu.memory_space<vmem>>, vector<1x2x16xf32>
    %7 = vector.shape_cast %6 : vector<1x2x16xf32> to vector<2x16xf32>
    %c0_5 = arith.constant 0 : index
    %c0_6 = arith.constant 0 : index
    %c0_7 = arith.constant 0 : index
    %8 = vector.load %arg7[%c0_5, %c0_6, %c0_7] : memref<1x16x128xf32, #tpu.memory_space<vmem>>, vector<1x16x128xf32>
    %9 = vector.shape_cast %8 : vector<1x16x128xf32> to vector<16x128xf32>
    %cst = arith.constant dense<0.000000e+00> : vector<2x128xf32>
    %10 = tpu.matmul %7, %9, %cst {dimension_numbers = #tpu.dot_dimension_numbers<[1], [0], [0], [1], [0, 0, 1, 1], [], []>} : vector<2x16xf32>, vector<16x128xf32>, vector<2x128xf32> -> vector<2x128xf32>
    %11 = arith.addf %5, %10 : vector<2x128xf32>
    %c0_8 = arith.constant 0 : index
    %c0_9 = arith.constant 0 : index
    %c0_10 = arith.constant 0 : index
    %12 = vector.load %arg12[%c0_8, %c0_9, %c0_10] : memref<1x2x32xf32, #tpu.memory_space<vmem>>, vector<1x2x32xf32>
    %13 = vector.shape_cast %12 : vector<1x2x32xf32> to vector<2x32xf32>
    %c0_11 = arith.constant 0 : index
    %c0_12 = arith.constant 0 : index
    %c0_13 = arith.constant 0 : index
    %14 = vector.load %arg13[%c0_11, %c0_12, %c0_13] : memref<1x2x32xf32, #tpu.memory_space<vmem>>, vector<1x2x32xf32>
    %15 = vector.shape_cast %14 : vector<1x2x32xf32> to vector<2x32xf32>
    %c0_14 = arith.constant 0 : index
    %c0_15 = arith.constant 0 : index
    %16 = vector.load %arg6[%c0_14, %c0_15] : memref<32x128xf32, #tpu.memory_space<vmem>>, vector<32x128xf32>
    %cst_16 = arith.constant dense<0.000000e+00> : vector<2x128xf32>
    %17 = tpu.matmul %13, %16, %cst_16 {dimension_numbers = #tpu.dot_dimension_numbers<[1], [0], [0], [1], [0, 0, 1, 1], [], []>} : vector<2x32xf32>, vector<32x128xf32>, vector<2x128xf32> -> vector<2x128xf32>
    %18 = arith.addf %11, %17 : vector<2x128xf32>
    %19 = vector.extract_strided_slice %18 {offsets = [0, 0], sizes = [2, 32], strides = [1, 1]} : vector<2x128xf32> to vector<2x32xf32>
    %20 = arith.negf %19 : vector<2x32xf32>
    %21 = math.exp %20 : vector<2x32xf32>
    %cst_17 = arith.constant 1.000000e+00 : f32
    %22 = vector.broadcast %cst_17 : f32 to vector<2x32xf32>
    %23 = arith.addf %22, %21 : vector<2x32xf32>
    %24 = arith.divf %22, %23 : vector<2x32xf32>
    %25 = vector.extract_strided_slice %18 {offsets = [0, 32], sizes = [2, 32], strides = [1, 1]} : vector<2x128xf32> to vector<2x32xf32>
    %26 = arith.negf %25 : vector<2x32xf32>
    %27 = math.exp %26 : vector<2x32xf32>
    %cst_18 = arith.constant 1.000000e+00 : f32
    %28 = vector.broadcast %cst_18 : f32 to vector<2x32xf32>
    %29 = arith.addf %28, %27 : vector<2x32xf32>
    %30 = arith.divf %28, %29 : vector<2x32xf32>
    %31 = vector.extract_strided_slice %18 {offsets = [0, 64], sizes = [2, 32], strides = [1, 1]} : vector<2x128xf32> to vector<2x32xf32>
    %32 = math.tanh %31 : vector<2x32xf32>
    %33 = vector.extract_strided_slice %18 {offsets = [0, 96], sizes = [2, 32], strides = [1, 1]} : vector<2x128xf32> to vector<2x32xf32>
    %34 = arith.negf %33 : vector<2x32xf32>
    %35 = math.exp %34 : vector<2x32xf32>
    %cst_19 = arith.constant 1.000000e+00 : f32
    %36 = vector.broadcast %cst_19 : f32 to vector<2x32xf32>
    %37 = arith.addf %36, %35 : vector<2x32xf32>
    %38 = arith.divf %36, %37 : vector<2x32xf32>
    %39 = arith.mulf %30, %15 : vector<2x32xf32>
    %40 = arith.mulf %24, %32 : vector<2x32xf32>
    %41 = arith.addf %39, %40 : vector<2x32xf32>
    %42 = math.tanh %41 : vector<2x32xf32>
    %43 = arith.mulf %38, %42 : vector<2x32xf32>
    %c0_20 = arith.constant 0 : index
    %c0_21 = arith.constant 0 : index
    %c0_22 = arith.constant 0 : index
    %44 = vector.load %arg12[%c0_20, %c0_21, %c0_22] : memref<1x2x32xf32, #tpu.memory_space<vmem>>, vector<1x2x32xf32>
    %45 = vector.shape_cast %44 : vector<1x2x32xf32> to vector<2x32xf32>
    %46 = vector.shape_cast %43 : vector<2x32xf32> to vector<1x2x32xf32>
    tpu.vector_store %arg12[%c0_20, %c0_21, %c0_22], %46 {strides = array<i32>} : memref<1x2x32xf32, #tpu.memory_space<vmem>>, vector<1x2x32xf32>,
    %c0_23 = arith.constant 0 : index
    %c0_24 = arith.constant 0 : index
    %c0_25 = arith.constant 0 : index
    %47 = vector.load %arg13[%c0_23, %c0_24, %c0_25] : memref<1x2x32xf32, #tpu.memory_space<vmem>>, vector<1x2x32xf32>
    %48 = vector.shape_cast %47 : vector<1x2x32xf32> to vector<2x32xf32>
    %49 = vector.shape_cast %41 : vector<2x32xf32> to vector<1x2x32xf32>
    tpu.vector_store %arg13[%c0_23, %c0_24, %c0_25], %49 {strides = array<i32>} : memref<1x2x32xf32, #tpu.memory_space<vmem>>, vector<1x2x32xf32>,
    %c0_26 = arith.constant 0 : index
    %c0_27 = arith.constant 0 : index
    %50 = vector.load %arg8[%c0_26, %c0_27] : memref<32x84xf32, #tpu.memory_space<vmem>>, vector<32x84xf32>
    %cst_28 = arith.constant dense<0.000000e+00> : vector<2x84xf32>
    %51 = tpu.matmul %43, %50, %cst_28 {dimension_numbers = #tpu.dot_dimension_numbers<[1], [0], [0], [1], [0, 0, 1, 1], [], []>} : vector<2x32xf32>, vector<32x84xf32>, vector<2x84xf32> -> vector<2x84xf32>
    %c0_29 = arith.constant 0 : index
    %c0_30 = arith.constant 0 : index
    %52 = vector.load %arg9[%c0_29, %c0_30] : memref<1x84xf32, #tpu.memory_space<vmem>>, vector<1x84xf32>
    %53 = vector.broadcast %52 : vector<1x84xf32> to vector<2x84xf32>
    %54 = arith.addf %51, %53 : vector<2x84xf32>
    %55 = vector.extract_strided_slice %54 {offsets = [0, 76], sizes = [2, 8], strides = [1, 1]} : vector<2x84xf32> to vector<2x8xf32>
    %56 = vector.extract_strided_slice %54 {offsets = [0, 0], sizes = [2, 22], strides = [1, 1]} : vector<2x84xf32> to vector<2x22xf32>
    %57 = vector.extract_strided_slice %56 {offsets = [0, 0], sizes = [2, 16], strides = [1, 1]} : vector<2x22xf32> to vector<2x16xf32>
    %58 = vector.extract_strided_slice %56 {offsets = [0, 16], sizes = [2, 1], strides = [1, 1]} : vector<2x22xf32> to vector<2x1xf32>
    %cst_31 = arith.constant 0.000000e+00 : f32
    %59 = vector.broadcast %cst_31 : f32 to vector<2x1xf32>
    %60 = arith.maximumf %58, %59 : vector<2x1xf32>
    %61 = vector.broadcast %cst_31 : f32 to vector<2x1xf32>
    %62 = arith.subf %58, %61 : vector<2x1xf32>
    %63 = arith.cmpf one, %62, %62 : vector<2x1xf32>
    %64 = vector.broadcast %cst_31 : f32 to vector<2x1xf32>
    %65 = arith.addf %58, %64 : vector<2x1xf32>
    %66 = math.absf %62 : vector<2x1xf32>
    %cst_32 = arith.constant 0.000000e+00 : f32
    %67 = vector.broadcast %cst_32 : f32 to vector<2x1xf32>
    %68 = arith.subf %67, %66 : vector<2x1xf32>
    %69 = math.exp %68 : vector<2x1xf32>
    %70 = math.log1p %69 : vector<2x1xf32>
    %71 = arith.addf %60, %70 : vector<2x1xf32>
    %72 = arith.select %63, %65, %71 : vector<2x1xi1>, vector<2x1xf32>
    %73 = vector.extract_strided_slice %56 {offsets = [0, 17], sizes = [2, 1], strides = [1, 1]} : vector<2x22xf32> to vector<2x1xf32>
    %74 = arith.negf %73 : vector<2x1xf32>
    %75 = math.exp %74 : vector<2x1xf32>
    %cst_33 = arith.constant 1.000000e+00 : f32
    %76 = vector.broadcast %cst_33 : f32 to vector<2x1xf32>
    %77 = arith.addf %76, %75 : vector<2x1xf32>
    %78 = arith.divf %76, %77 : vector<2x1xf32>
    %79 = vector.extract_strided_slice %56 {offsets = [0, 18], sizes = [2, 3], strides = [1, 1]} : vector<2x22xf32> to vector<2x3xf32>
    %cst_34 = arith.constant dense<0xFF800000> : vector<2xf32>
    %80 = vector.multi_reduction <maximumf>, %79, %cst_34 [1] : vector<2x3xf32> to vector<2xf32>
    %81 = vector.shape_cast %80 : vector<2xf32> to vector<2x1xf32>
    %82 = vector.broadcast %81 : vector<2x1xf32> to vector<2x3xf32>
    %83 = arith.subf %79, %82 : vector<2x3xf32>
    %84 = math.exp %83 : vector<2x3xf32>
    %cst_35 = arith.constant dense<0.000000e+00> : vector<2xf32>
    %85 = vector.multi_reduction <add>, %84, %cst_35 [1] : vector<2x3xf32> to vector<2xf32>
    %86 = vector.shape_cast %85 : vector<2xf32> to vector<2x1xf32>
    %87 = tpu.reciprocal %86 {approx = true} : vector<2x1xf32> -> vector<2x1xf32>
    %88 = vector.broadcast %87 : vector<2x1xf32> to vector<2x3xf32>
    %89 = arith.mulf %84, %88 : vector<2x3xf32>
    %90 = vector.extract_strided_slice %56 {offsets = [0, 21], sizes = [2, 1], strides = [1, 1]} : vector<2x22xf32> to vector<2x1xf32>
    %cst_36 = arith.constant 0.000000e+00 : f32
    %91 = vector.broadcast %cst_36 : f32 to vector<2x1xf32>
    %92 = arith.maximumf %90, %91 : vector<2x1xf32>
    %93 = vector.broadcast %cst_36 : f32 to vector<2x1xf32>
    %94 = arith.subf %90, %93 : vector<2x1xf32>
    %95 = arith.cmpf one, %94, %94 : vector<2x1xf32>
    %96 = vector.broadcast %cst_36 : f32 to vector<2x1xf32>
    %97 = arith.addf %90, %96 : vector<2x1xf32>
    %98 = math.absf %94 : vector<2x1xf32>
    %cst_37 = arith.constant 0.000000e+00 : f32
    %99 = vector.broadcast %cst_37 : f32 to vector<2x1xf32>
    %100 = arith.subf %99, %98 : vector<2x1xf32>
    %101 = math.exp %100 : vector<2x1xf32>
    %102 = math.log1p %101 : vector<2x1xf32>
    %103 = arith.addf %92, %102 : vector<2x1xf32>
    %104 = arith.select %95, %97, %103 : vector<2x1xi1>, vector<2x1xf32>
    %cst_38 = arith.constant 1.000000e+00 : f32
    %105 = vector.broadcast %cst_38 : f32 to vector<2x1xf32>
    %106 = arith.addf %105, %104 : vector<2x1xf32>
    %c0_39 = arith.constant 0 : index
    %c0_40 = arith.constant 0 : index
    %c0_41 = arith.constant 0 : index
    %107 = vector.load %arg16[%c0_39, %c0_40, %c0_41] : memref<1x2x16xf32, #tpu.memory_space<vmem>>, vector<1x2x16xf32>
    %108 = vector.shape_cast %107 : vector<1x2x16xf32> to vector<2x16xf32>
    %c0_42 = arith.constant 0 : index
    %c0_43 = arith.constant 0 : index
    %c0_44 = arith.constant 0 : index
    %109 = vector.load %arg14[%c0_42, %c0_43, %c0_44] : memref<2x16x16xf32, #tpu.memory_space<vmem>>, vector<2x16x16xf32>
    %cst_45 = arith.constant 1.000000e-16 : f32
    %110 = vector.broadcast %cst_45 : f32 to vector<2x16x16xf32>
    %111 = arith.addf %109, %110 : vector<2x16x16xf32>
    %cst_46 = arith.constant 1.000000e-16 : f32
    %112 = vector.broadcast %cst_46 : f32 to vector<2x16xf32>
    %113 = arith.addf %57, %112 : vector<2x16xf32>
    %114 = vector.shape_cast %113 : vector<2x16xf32> to vector<2x1x16xf32>
    %115 = vector.broadcast %114 : vector<2x1x16xf32> to vector<2x16x16xf32>
    %116 = arith.mulf %111, %115 : vector<2x16x16xf32>
    %cst_47 = arith.constant dense<0.000000e+00> : vector<2x16xf32>
    %117 = vector.multi_reduction <add>, %116, %cst_47 [2] : vector<2x16x16xf32> to vector<2x16xf32>
    %118 = arith.mulf %111, %111 : vector<2x16x16xf32>
    %cst_48 = arith.constant dense<0.000000e+00> : vector<2x16xf32>
    %119 = vector.multi_reduction <add>, %118, %cst_48 [2] : vector<2x16x16xf32> to vector<2x16xf32>
    %120 = arith.mulf %113, %113 : vector<2x16xf32>
    %cst_49 = arith.constant dense<0.000000e+00> : vector<2xf32>
    %121 = vector.multi_reduction <add>, %120, %cst_49 [1] : vector<2x16xf32> to vector<2xf32>
    %122 = vector.shape_cast %121 : vector<2xf32> to vector<2x1xf32>
    %cst_50 = arith.constant 1.000000e-16 : f32
    %123 = vector.broadcast %cst_50 : f32 to vector<2x16xf32>
    %124 = arith.maximumf %119, %123 : vector<2x16xf32>
    %125 = math.rsqrt %124 : vector<2x16xf32>
    %cst_51 = arith.constant 1.000000e-16 : f32
    %126 = vector.broadcast %cst_51 : f32 to vector<2x1xf32>
    %127 = arith.maximumf %122, %126 : vector<2x1xf32>
    %128 = math.rsqrt %127 : vector<2x1xf32>
    %129 = vector.broadcast %128 : vector<2x1xf32> to vector<2x16xf32>
    %130 = arith.mulf %125, %129 : vector<2x16xf32>
    %131 = arith.mulf %117, %130 : vector<2x16xf32>
    %132 = vector.broadcast %72 : vector<2x1xf32> to vector<2x16xf32>
    %133 = arith.mulf %132, %131 : vector<2x16xf32>
    %cst_52 = arith.constant dense<0xFF800000> : vector<2xf32>
    %134 = vector.multi_reduction <maximumf>, %133, %cst_52 [1] : vector<2x16xf32> to vector<2xf32>
    %135 = vector.shape_cast %134 : vector<2xf32> to vector<2x1xf32>
    %136 = vector.broadcast %135 : vector<2x1xf32> to vector<2x16xf32>
    %137 = arith.subf %133, %136 : vector<2x16xf32>
    %138 = math.exp %137 : vector<2x16xf32>
    %cst_53 = arith.constant dense<0.000000e+00> : vector<2xf32>
    %139 = vector.multi_reduction <add>, %138, %cst_53 [1] : vector<2x16xf32> to vector<2xf32>
    %140 = vector.shape_cast %139 : vector<2xf32> to vector<2x1xf32>
    %141 = tpu.reciprocal %140 {approx = true} : vector<2x1xf32> -> vector<2x1xf32>
    %142 = vector.broadcast %141 : vector<2x1xf32> to vector<2x16xf32>
    %143 = arith.mulf %138, %142 : vector<2x16xf32>
    %144 = vector.broadcast %78 : vector<2x1xf32> to vector<2x16xf32>
    %145 = arith.mulf %144, %143 : vector<2x16xf32>
    %cst_54 = arith.constant 1.000000e+00 : f32
    %146 = vector.broadcast %cst_54 : f32 to vector<2x1xf32>
    %147 = arith.subf %146, %78 : vector<2x1xf32>
    %148 = vector.broadcast %147 : vector<2x1xf32> to vector<2x16xf32>
    %149 = arith.mulf %148, %108 : vector<2x16xf32>
    %150 = arith.addf %145, %149 : vector<2x16xf32>
    %151 = vector.extract_strided_slice %150 {offsets = [0, 15], sizes = [2, 1], strides = [1, 1]} : vector<2x16xf32> to vector<2x1xf32>
    %152 = vector.extract_strided_slice %150 {offsets = [0, 0], sizes = [2, 1], strides = [1, 1]} : vector<2x16xf32> to vector<2x1xf32>
    %153 = tpu.concatenate %151, %150, %152 in 1 : vector<2x1xf32>, vector<2x16xf32>, vector<2x1xf32> -> vector<2x18xf32>
    %154 = vector.extract_strided_slice %153 {offsets = [0, 0], sizes = [2, 16], strides = [1, 1]} : vector<2x18xf32> to vector<2x16xf32>
    %155 = vector.extract_strided_slice %89 {offsets = [0, 0], sizes = [2, 1], strides = [1, 1]} : vector<2x3xf32> to vector<2x1xf32>
    %156 = vector.broadcast %155 : vector<2x1xf32> to vector<2x16xf32>
    %157 = arith.mulf %154, %156 : vector<2x16xf32>
    %158 = vector.extract_strided_slice %153 {offsets = [0, 1], sizes = [2, 16], strides = [1, 1]} : vector<2x18xf32> to vector<2x16xf32>
    %159 = vector.extract_strided_slice %89 {offsets = [0, 1], sizes = [2, 1], strides = [1, 1]} : vector<2x3xf32> to vector<2x1xf32>
    %160 = vector.broadcast %159 : vector<2x1xf32> to vector<2x16xf32>
    %161 = arith.mulf %158, %160 : vector<2x16xf32>
    %162 = arith.addf %157, %161 : vector<2x16xf32>
    %163 = vector.extract_strided_slice %153 {offsets = [0, 2], sizes = [2, 16], strides = [1, 1]} : vector<2x18xf32> to vector<2x16xf32>
    %164 = vector.extract_strided_slice %89 {offsets = [0, 2], sizes = [2, 1], strides = [1, 1]} : vector<2x3xf32> to vector<2x1xf32>
    %165 = vector.broadcast %164 : vector<2x1xf32> to vector<2x16xf32>
    %166 = arith.mulf %163, %165 : vector<2x16xf32>
    %167 = arith.addf %162, %166 : vector<2x16xf32>
    %cst_55 = arith.constant 1.000000e-30 : f32
    %168 = vector.broadcast %cst_55 : f32 to vector<2x16xf32>
    %169 = arith.maximumf %167, %168 : vector<2x16xf32>
    %170 = math.log %169 : vector<2x16xf32>
    %171 = vector.broadcast %106 : vector<2x1xf32> to vector<2x16xf32>
    %172 = arith.mulf %171, %170 : vector<2x16xf32>
    %173 = math.exp %172 : vector<2x16xf32>
    %cst_56 = arith.constant dense<0.000000e+00> : vector<2xf32>
    %174 = vector.multi_reduction <add>, %173, %cst_56 [1] : vector<2x16xf32> to vector<2xf32>
    %175 = vector.shape_cast %174 : vector<2xf32> to vector<2x1xf32>
    %cst_57 = arith.constant 1.000000e-16 : f32
    %176 = vector.broadcast %cst_57 : f32 to vector<2x1xf32>
    %177 = arith.addf %175, %176 : vector<2x1xf32>
    %178 = tpu.reciprocal %177 {approx = true} : vector<2x1xf32> -> vector<2x1xf32>
    %179 = vector.broadcast %178 : vector<2x1xf32> to vector<2x16xf32>
    %180 = arith.mulf %173, %179 : vector<2x16xf32>
    %c0_58 = arith.constant 0 : index
    %c0_59 = arith.constant 0 : index
    %c0_60 = arith.constant 0 : index
    %181 = vector.load %arg16[%c0_58, %c0_59, %c0_60] : memref<1x2x16xf32, #tpu.memory_space<vmem>>, vector<1x2x16xf32>
    %182 = vector.shape_cast %181 : vector<1x2x16xf32> to vector<2x16xf32>
    %183 = vector.shape_cast %180 : vector<2x16xf32> to vector<1x2x16xf32>
    tpu.vector_store %arg16[%c0_58, %c0_59, %c0_60], %183 {strides = array<i32>} : memref<1x2x16xf32, #tpu.memory_space<vmem>>, vector<1x2x16xf32>,
    %184 = vector.shape_cast %180 : vector<2x16xf32> to vector<2x16x1xf32>
    %c0_61 = arith.constant 0 : index
    %c0_62 = arith.constant 0 : index
    %c0_63 = arith.constant 0 : index
    %185 = vector.load %arg14[%c0_61, %c0_62, %c0_63] : memref<2x16x16xf32, #tpu.memory_space<vmem>>, vector<2x16x16xf32>
    %186 = vector.broadcast %184 : vector<2x16x1xf32> to vector<2x16x16xf32>
    %187 = arith.mulf %186, %185 : vector<2x16x16xf32>
    %cst_64 = arith.constant dense<0.000000e+00> : vector<2x16xf32>
    %188 = vector.multi_reduction <add>, %187, %cst_64 [1] : vector<2x16x16xf32> to vector<2x16xf32>
    %c0_65 = arith.constant 0 : index
    %c0_66 = arith.constant 0 : index
    %c0_67 = arith.constant 0 : index
    %189 = vector.load %arg15[%c0_65, %c0_66, %c0_67] : memref<1x2x16xf32, #tpu.memory_space<vmem>>, vector<1x2x16xf32>
    %190 = vector.shape_cast %189 : vector<1x2x16xf32> to vector<2x16xf32>
    %191 = vector.shape_cast %188 : vector<2x16xf32> to vector<1x2x16xf32>
    tpu.vector_store %arg15[%c0_65, %c0_66, %c0_67], %191 {strides = array<i32>} : memref<1x2x16xf32, #tpu.memory_space<vmem>>, vector<1x2x16xf32>,
    %c0_68 = arith.constant 0 : index
    %c0_69 = arith.constant 0 : index
    %c0_70 = arith.constant 0 : index
    %192 = vector.load %arg10[%c0_68, %c0_69, %c0_70] : memref<1x16x8xf32, #tpu.memory_space<vmem>>, vector<1x16x8xf32>
    %193 = vector.shape_cast %192 : vector<1x16x8xf32> to vector<16x8xf32>
    %cst_71 = arith.constant dense<0.000000e+00> : vector<2x8xf32>
    %194 = tpu.matmul %188, %193, %cst_71 {dimension_numbers = #tpu.dot_dimension_numbers<[1], [0], [0], [1], [0, 0, 1, 1], [], []>} : vector<2x16xf32>, vector<16x8xf32>, vector<2x8xf32> -> vector<2x8xf32>
    %195 = arith.addf %55, %194 : vector<2x8xf32>
    %196 = vector.extract_strided_slice %54 {offsets = [0, 22], sizes = [2, 54], strides = [1, 1]} : vector<2x84xf32> to vector<2x54xf32>
    %197 = vector.extract_strided_slice %196 {offsets = [0, 0], sizes = [2, 16], strides = [1, 1]} : vector<2x54xf32> to vector<2x16xf32>
    %198 = vector.extract_strided_slice %196 {offsets = [0, 16], sizes = [2, 1], strides = [1, 1]} : vector<2x54xf32> to vector<2x1xf32>
    %cst_72 = arith.constant 0.000000e+00 : f32
    %199 = vector.broadcast %cst_72 : f32 to vector<2x1xf32>
    %200 = arith.maximumf %198, %199 : vector<2x1xf32>
    %201 = vector.broadcast %cst_72 : f32 to vector<2x1xf32>
    %202 = arith.subf %198, %201 : vector<2x1xf32>
    %203 = arith.cmpf one, %202, %202 : vector<2x1xf32>
    %204 = vector.broadcast %cst_72 : f32 to vector<2x1xf32>
    %205 = arith.addf %198, %204 : vector<2x1xf32>
    %206 = math.absf %202 : vector<2x1xf32>
    %cst_73 = arith.constant 0.000000e+00 : f32
    %207 = vector.broadcast %cst_73 : f32 to vector<2x1xf32>
    %208 = arith.subf %207, %206 : vector<2x1xf32>
    %209 = math.exp %208 : vector<2x1xf32>
    %210 = math.log1p %209 : vector<2x1xf32>
    %211 = arith.addf %200, %210 : vector<2x1xf32>
    %212 = arith.select %203, %205, %211 : vector<2x1xi1>, vector<2x1xf32>
    %213 = vector.extract_strided_slice %196 {offsets = [0, 17], sizes = [2, 1], strides = [1, 1]} : vector<2x54xf32> to vector<2x1xf32>
    %214 = arith.negf %213 : vector<2x1xf32>
    %215 = math.exp %214 : vector<2x1xf32>
    %cst_74 = arith.constant 1.000000e+00 : f32
    %216 = vector.broadcast %cst_74 : f32 to vector<2x1xf32>
    %217 = arith.addf %216, %215 : vector<2x1xf32>
    %218 = arith.divf %216, %217 : vector<2x1xf32>
    %219 = vector.extract_strided_slice %196 {offsets = [0, 18], sizes = [2, 3], strides = [1, 1]} : vector<2x54xf32> to vector<2x3xf32>
    %cst_75 = arith.constant dense<0xFF800000> : vector<2xf32>
    %220 = vector.multi_reduction <maximumf>, %219, %cst_75 [1] : vector<2x3xf32> to vector<2xf32>
    %221 = vector.shape_cast %220 : vector<2xf32> to vector<2x1xf32>
    %222 = vector.broadcast %221 : vector<2x1xf32> to vector<2x3xf32>
    %223 = arith.subf %219, %222 : vector<2x3xf32>
    %224 = math.exp %223 : vector<2x3xf32>
    %cst_76 = arith.constant dense<0.000000e+00> : vector<2xf32>
    %225 = vector.multi_reduction <add>, %224, %cst_76 [1] : vector<2x3xf32> to vector<2xf32>
    %226 = vector.shape_cast %225 : vector<2xf32> to vector<2x1xf32>
    %227 = tpu.reciprocal %226 {approx = true} : vector<2x1xf32> -> vector<2x1xf32>
    %228 = vector.broadcast %227 : vector<2x1xf32> to vector<2x3xf32>
    %229 = arith.mulf %224, %228 : vector<2x3xf32>
    %230 = vector.extract_strided_slice %196 {offsets = [0, 21], sizes = [2, 1], strides = [1, 1]} : vector<2x54xf32> to vector<2x1xf32>
    %cst_77 = arith.constant 0.000000e+00 : f32
    %231 = vector.broadcast %cst_77 : f32 to vector<2x1xf32>
    %232 = arith.maximumf %230, %231 : vector<2x1xf32>
    %233 = vector.broadcast %cst_77 : f32 to vector<2x1xf32>
    %234 = arith.subf %230, %233 : vector<2x1xf32>
    %235 = arith.cmpf one, %234, %234 : vector<2x1xf32>
    %236 = vector.broadcast %cst_77 : f32 to vector<2x1xf32>
    %237 = arith.addf %230, %236 : vector<2x1xf32>
    %238 = math.absf %234 : vector<2x1xf32>
    %cst_78 = arith.constant 0.000000e+00 : f32
    %239 = vector.broadcast %cst_78 : f32 to vector<2x1xf32>
    %240 = arith.subf %239, %238 : vector<2x1xf32>
    %241 = math.exp %240 : vector<2x1xf32>
    %242 = math.log1p %241 : vector<2x1xf32>
    %243 = arith.addf %232, %242 : vector<2x1xf32>
    %244 = arith.select %235, %237, %243 : vector<2x1xi1>, vector<2x1xf32>
    %cst_79 = arith.constant 1.000000e+00 : f32
    %245 = vector.broadcast %cst_79 : f32 to vector<2x1xf32>
    %246 = arith.addf %245, %244 : vector<2x1xf32>
    %c0_80 = arith.constant 0 : index
    %c0_81 = arith.constant 0 : index
    %c0_82 = arith.constant 0 : index
    %247 = vector.load %arg17[%c0_80, %c0_81, %c0_82] : memref<1x2x16xf32, #tpu.memory_space<vmem>>, vector<1x2x16xf32>
    %248 = vector.shape_cast %247 : vector<1x2x16xf32> to vector<2x16xf32>
    %c0_83 = arith.constant 0 : index
    %c0_84 = arith.constant 0 : index
    %c0_85 = arith.constant 0 : index
    %249 = vector.load %arg14[%c0_83, %c0_84, %c0_85] : memref<2x16x16xf32, #tpu.memory_space<vmem>>, vector<2x16x16xf32>
    %cst_86 = arith.constant 1.000000e-16 : f32
    %250 = vector.broadcast %cst_86 : f32 to vector<2x16x16xf32>
    %251 = arith.addf %249, %250 : vector<2x16x16xf32>
    %cst_87 = arith.constant 1.000000e-16 : f32
    %252 = vector.broadcast %cst_87 : f32 to vector<2x16xf32>
    %253 = arith.addf %197, %252 : vector<2x16xf32>
    %254 = vector.shape_cast %253 : vector<2x16xf32> to vector<2x1x16xf32>
    %255 = vector.broadcast %254 : vector<2x1x16xf32> to vector<2x16x16xf32>
    %256 = arith.mulf %251, %255 : vector<2x16x16xf32>
    %cst_88 = arith.constant dense<0.000000e+00> : vector<2x16xf32>
    %257 = vector.multi_reduction <add>, %256, %cst_88 [2] : vector<2x16x16xf32> to vector<2x16xf32>
    %258 = arith.mulf %251, %251 : vector<2x16x16xf32>
    %cst_89 = arith.constant dense<0.000000e+00> : vector<2x16xf32>
    %259 = vector.multi_reduction <add>, %258, %cst_89 [2] : vector<2x16x16xf32> to vector<2x16xf32>
    %260 = arith.mulf %253, %253 : vector<2x16xf32>
    %cst_90 = arith.constant dense<0.000000e+00> : vector<2xf32>
    %261 = vector.multi_reduction <add>, %260, %cst_90 [1] : vector<2x16xf32> to vector<2xf32>
    %262 = vector.shape_cast %261 : vector<2xf32> to vector<2x1xf32>
    %cst_91 = arith.constant 1.000000e-16 : f32
    %263 = vector.broadcast %cst_91 : f32 to vector<2x16xf32>
    %264 = arith.maximumf %259, %263 : vector<2x16xf32>
    %265 = math.rsqrt %264 : vector<2x16xf32>
    %cst_92 = arith.constant 1.000000e-16 : f32
    %266 = vector.broadcast %cst_92 : f32 to vector<2x1xf32>
    %267 = arith.maximumf %262, %266 : vector<2x1xf32>
    %268 = math.rsqrt %267 : vector<2x1xf32>
    %269 = vector.broadcast %268 : vector<2x1xf32> to vector<2x16xf32>
    %270 = arith.mulf %265, %269 : vector<2x16xf32>
    %271 = arith.mulf %257, %270 : vector<2x16xf32>
    %272 = vector.broadcast %212 : vector<2x1xf32> to vector<2x16xf32>
    %273 = arith.mulf %272, %271 : vector<2x16xf32>
    %cst_93 = arith.constant dense<0xFF800000> : vector<2xf32>
    %274 = vector.multi_reduction <maximumf>, %273, %cst_93 [1] : vector<2x16xf32> to vector<2xf32>
    %275 = vector.shape_cast %274 : vector<2xf32> to vector<2x1xf32>
    %276 = vector.broadcast %275 : vector<2x1xf32> to vector<2x16xf32>
    %277 = arith.subf %273, %276 : vector<2x16xf32>
    %278 = math.exp %277 : vector<2x16xf32>
    %cst_94 = arith.constant dense<0.000000e+00> : vector<2xf32>
    %279 = vector.multi_reduction <add>, %278, %cst_94 [1] : vector<2x16xf32> to vector<2xf32>
    %280 = vector.shape_cast %279 : vector<2xf32> to vector<2x1xf32>
    %281 = tpu.reciprocal %280 {approx = true} : vector<2x1xf32> -> vector<2x1xf32>
    %282 = vector.broadcast %281 : vector<2x1xf32> to vector<2x16xf32>
    %283 = arith.mulf %278, %282 : vector<2x16xf32>
    %284 = vector.broadcast %218 : vector<2x1xf32> to vector<2x16xf32>
    %285 = arith.mulf %284, %283 : vector<2x16xf32>
    %cst_95 = arith.constant 1.000000e+00 : f32
    %286 = vector.broadcast %cst_95 : f32 to vector<2x1xf32>
    %287 = arith.subf %286, %218 : vector<2x1xf32>
    %288 = vector.broadcast %287 : vector<2x1xf32> to vector<2x16xf32>
    %289 = arith.mulf %288, %248 : vector<2x16xf32>
    %290 = arith.addf %285, %289 : vector<2x16xf32>
    %291 = vector.extract_strided_slice %290 {offsets = [0, 15], sizes = [2, 1], strides = [1, 1]} : vector<2x16xf32> to vector<2x1xf32>
    %292 = vector.extract_strided_slice %290 {offsets = [0, 0], sizes = [2, 1], strides = [1, 1]} : vector<2x16xf32> to vector<2x1xf32>
    %293 = tpu.concatenate %291, %290, %292 in 1 : vector<2x1xf32>, vector<2x16xf32>, vector<2x1xf32> -> vector<2x18xf32>
    %294 = vector.extract_strided_slice %293 {offsets = [0, 0], sizes = [2, 16], strides = [1, 1]} : vector<2x18xf32> to vector<2x16xf32>
    %295 = vector.extract_strided_slice %229 {offsets = [0, 0], sizes = [2, 1], strides = [1, 1]} : vector<2x3xf32> to vector<2x1xf32>
    %296 = vector.broadcast %295 : vector<2x1xf32> to vector<2x16xf32>
    %297 = arith.mulf %294, %296 : vector<2x16xf32>
    %298 = vector.extract_strided_slice %293 {offsets = [0, 1], sizes = [2, 16], strides = [1, 1]} : vector<2x18xf32> to vector<2x16xf32>
    %299 = vector.extract_strided_slice %229 {offsets = [0, 1], sizes = [2, 1], strides = [1, 1]} : vector<2x3xf32> to vector<2x1xf32>
    %300 = vector.broadcast %299 : vector<2x1xf32> to vector<2x16xf32>
    %301 = arith.mulf %298, %300 : vector<2x16xf32>
    %302 = arith.addf %297, %301 : vector<2x16xf32>
    %303 = vector.extract_strided_slice %293 {offsets = [0, 2], sizes = [2, 16], strides = [1, 1]} : vector<2x18xf32> to vector<2x16xf32>
    %304 = vector.extract_strided_slice %229 {offsets = [0, 2], sizes = [2, 1], strides = [1, 1]} : vector<2x3xf32> to vector<2x1xf32>
    %305 = vector.broadcast %304 : vector<2x1xf32> to vector<2x16xf32>
    %306 = arith.mulf %303, %305 : vector<2x16xf32>
    %307 = arith.addf %302, %306 : vector<2x16xf32>
    %cst_96 = arith.constant 1.000000e-30 : f32
    %308 = vector.broadcast %cst_96 : f32 to vector<2x16xf32>
    %309 = arith.maximumf %307, %308 : vector<2x16xf32>
    %310 = math.log %309 : vector<2x16xf32>
    %311 = vector.broadcast %246 : vector<2x1xf32> to vector<2x16xf32>
    %312 = arith.mulf %311, %310 : vector<2x16xf32>
    %313 = math.exp %312 : vector<2x16xf32>
    %cst_97 = arith.constant dense<0.000000e+00> : vector<2xf32>
    %314 = vector.multi_reduction <add>, %313, %cst_97 [1] : vector<2x16xf32> to vector<2xf32>
    %315 = vector.shape_cast %314 : vector<2xf32> to vector<2x1xf32>
    %cst_98 = arith.constant 1.000000e-16 : f32
    %316 = vector.broadcast %cst_98 : f32 to vector<2x1xf32>
    %317 = arith.addf %315, %316 : vector<2x1xf32>
    %318 = tpu.reciprocal %317 {approx = true} : vector<2x1xf32> -> vector<2x1xf32>
    %319 = vector.broadcast %318 : vector<2x1xf32> to vector<2x16xf32>
    %320 = arith.mulf %313, %319 : vector<2x16xf32>
    %c0_99 = arith.constant 0 : index
    %c0_100 = arith.constant 0 : index
    %c0_101 = arith.constant 0 : index
    %321 = vector.load %arg17[%c0_99, %c0_100, %c0_101] : memref<1x2x16xf32, #tpu.memory_space<vmem>>, vector<1x2x16xf32>
    %322 = vector.shape_cast %321 : vector<1x2x16xf32> to vector<2x16xf32>
    %323 = vector.shape_cast %320 : vector<2x16xf32> to vector<1x2x16xf32>
    tpu.vector_store %arg17[%c0_99, %c0_100, %c0_101], %323 {strides = array<i32>} : memref<1x2x16xf32, #tpu.memory_space<vmem>>, vector<1x2x16xf32>,
    %324 = vector.extract_strided_slice %196 {offsets = [0, 22], sizes = [2, 16], strides = [1, 1]} : vector<2x54xf32> to vector<2x16xf32>
    %325 = arith.negf %324 : vector<2x16xf32>
    %326 = math.exp %325 : vector<2x16xf32>
    %cst_102 = arith.constant 1.000000e+00 : f32
    %327 = vector.broadcast %cst_102 : f32 to vector<2x16xf32>
    %328 = arith.addf %327, %326 : vector<2x16xf32>
    %329 = arith.divf %327, %328 : vector<2x16xf32>
    %330 = vector.extract_strided_slice %196 {offsets = [0, 38], sizes = [2, 16], strides = [1, 1]} : vector<2x54xf32> to vector<2x16xf32>
    %c0_103 = arith.constant 0 : index
    %c0_104 = arith.constant 0 : index
    %c0_105 = arith.constant 0 : index
    %331 = vector.load %arg14[%c0_103, %c0_104, %c0_105] : memref<2x16x16xf32, #tpu.memory_space<vmem>>, vector<2x16x16xf32>
    %332 = vector.shape_cast %320 : vector<2x16xf32> to vector<2x16x1xf32>
    %333 = vector.shape_cast %329 : vector<2x16xf32> to vector<2x1x16xf32>
    %334 = vector.broadcast %332 : vector<2x16x1xf32> to vector<2x16x16xf32>
    %335 = vector.broadcast %333 : vector<2x1x16xf32> to vector<2x16x16xf32>
    %336 = arith.mulf %334, %335 : vector<2x16x16xf32>
    %cst_106 = arith.constant 1.000000e+00 : f32
    %337 = vector.broadcast %cst_106 : f32 to vector<2x16x16xf32>
    %338 = arith.subf %337, %336 : vector<2x16x16xf32>
    %339 = arith.mulf %331, %338 : vector<2x16x16xf32>
    %340 = vector.shape_cast %320 : vector<2x16xf32> to vector<2x16x1xf32>
    %341 = vector.shape_cast %330 : vector<2x16xf32> to vector<2x1x16xf32>
    %342 = vector.broadcast %340 : vector<2x16x1xf32> to vector<2x16x16xf32>
    %343 = vector.broadcast %341 : vector<2x1x16xf32> to vector<2x16x16xf32>
    %344 = arith.mulf %342, %343 : vector<2x16x16xf32>
    %345 = arith.addf %339, %344 : vector<2x16x16xf32>
    %c0_107 = arith.constant 0 : index
    %c0_108 = arith.constant 0 : index
    %c0_109 = arith.constant 0 : index
    %346 = vector.load %arg14[%c0_107, %c0_108, %c0_109] : memref<2x16x16xf32, #tpu.memory_space<vmem>>, vector<2x16x16xf32>
    tpu.vector_store %arg14[%c0_107, %c0_108, %c0_109], %345 {strides = array<i32>} : memref<2x16x16xf32, #tpu.memory_space<vmem>>, vector<2x16x16xf32>,
    %347 = arith.negf %195 : vector<2x8xf32>
    %348 = math.exp %347 : vector<2x8xf32>
    %cst_110 = arith.constant 1.000000e+00 : f32
    %349 = vector.broadcast %cst_110 : f32 to vector<2x8xf32>
    %350 = arith.addf %349, %348 : vector<2x8xf32>
    %351 = arith.divf %349, %350 : vector<2x8xf32>
    %352 = arith.index_cast %arg0 : i32 to index
    %c0_111 = arith.constant 0 : index
    %c0_112 = arith.constant 0 : index
    %353 = vector.load %arg11[%352, %c0_111, %c0_112] : memref<8x2x8xf32, #tpu.memory_space<vmem>>, vector<1x2x8xf32>
    %354 = vector.shape_cast %353 : vector<1x2x8xf32> to vector<2x8xf32>
    %355 = vector.shape_cast %351 : vector<2x8xf32> to vector<1x2x8xf32>
    tpu.vector_store %arg11[%352, %c0_111, %c0_112], %355 {strides = array<i32>} : memref<8x2x8xf32, #tpu.memory_space<vmem>>, vector<1x2x8xf32>,
    return
  }
  func.func @transform_0(%arg0: i32) -> (i32, i32, i32) {
    %c0_i32 = arith.constant 0 : i32
    %c0_i32_0 = arith.constant 0 : i32
    %c0_i32_1 = arith.constant 0 : i32
    %c0_i32_2 = arith.constant 0 : i32
    return %c0_i32, %c0_i32_0, %c0_i32_1 : i32, i32, i32
  }
  func.func @transform_1(%arg0: i32) -> (i32, i32, i32) {
    %c0_i32 = arith.constant 0 : i32
    %c0_i32_0 = arith.constant 0 : i32
    %c0_i32_1 = arith.constant 0 : i32
    %c0_i32_2 = arith.constant 0 : i32
    return %c0_i32, %c0_i32_0, %c0_i32_1 : i32, i32, i32
  }
  func.func @transform_2(%arg0: i32) -> (i32, i32, i32) {
    %c0_i32 = arith.constant 0 : i32
    %c0_i32_0 = arith.constant 0 : i32
    %c0_i32_1 = arith.constant 0 : i32
    %c0_i32_2 = arith.constant 0 : i32
    return %c0_i32, %c0_i32_0, %c0_i32_1 : i32, i32, i32
  }
  func.func @transform_3(%arg0: i32) -> (i32, i32, i32) {
    %c0_i32 = arith.constant 0 : i32
    %c0_i32_0 = arith.constant 0 : i32
    %c0_i32_1 = arith.constant 0 : i32
    %c0_i32_2 = arith.constant 0 : i32
    return %c0_i32, %c0_i32_0, %c0_i32_1 : i32, i32, i32
  }
  func.func @transform_4(%arg0: i32) -> (i32, i32) {
    %c0_i32 = arith.constant 0 : i32
    %c0_i32_0 = arith.constant 0 : i32
    %c0_i32_1 = arith.constant 0 : i32
    return %c0_i32, %c0_i32_0 : i32, i32
  }
  func.func @transform_5(%arg0: i32) -> (i32, i32) {
    %c0_i32 = arith.constant 0 : i32
    %c0_i32_0 = arith.constant 0 : i32
    %c0_i32_1 = arith.constant 0 : i32
    return %c0_i32, %c0_i32_0 : i32, i32
  }
  func.func @transform_6(%arg0: i32) -> (i32, i32, i32) {
    %c0_i32 = arith.constant 0 : i32
    %c0_i32_0 = arith.constant 0 : i32
    %c0_i32_1 = arith.constant 0 : i32
    %c0_i32_2 = arith.constant 0 : i32
    return %c0_i32, %c0_i32_0, %c0_i32_1 : i32, i32, i32
  }
  func.func @transform_7(%arg0: i32) -> (i32, i32) {
    %c0_i32 = arith.constant 0 : i32
    %c0_i32_0 = arith.constant 0 : i32
    %c0_i32_1 = arith.constant 0 : i32
    return %c0_i32, %c0_i32_0 : i32, i32
  }
  func.func @transform_8(%arg0: i32) -> (i32, i32) {
    %c0_i32 = arith.constant 0 : i32
    %c0_i32_0 = arith.constant 0 : i32
    %c0_i32_1 = arith.constant 0 : i32
    return %c0_i32, %c0_i32_0 : i32, i32
  }
  func.func @transform_9(%arg0: i32) -> (i32, i32, i32) {
    %c0_i32 = arith.constant 0 : i32
    %c0_i32_0 = arith.constant 0 : i32
    %c0_i32_1 = arith.constant 0 : i32
    %c0_i32_2 = arith.constant 0 : i32
    return %c0_i32, %c0_i32_0, %c0_i32_1 : i32, i32, i32
  }
  func.func @transform_10(%arg0: i32) -> (i32, i32, i32) {
    %c0_i32 = arith.constant 0 : i32
    %c0_i32_0 = arith.constant 0 : i32
    %c0_i32_1 = arith.constant 0 : i32
    %c0_i32_2 = arith.constant 0 : i32
    return %c0_i32, %c0_i32_0, %c0_i32_1 : i32, i32, i32
  }
}

</mosaic_0001>

<bundles_post_ra>
// kernel: ntm_forward.1
= control target key start
LH: loop header
LB: loop body
LE: loop exit
PB: predicated region body
PF: predicated region fallthrough
CT: control target
= control target key end

     0   :  { %15 = vsyncpa [#allocation9], 0  ;;  %s1574_s13 = smov 0   ;;  %s1923_s0 = inlined_call_operand.vmem [shape: f32[8,2,128], index: 0, kind: input, shape index: {}]   ;;  %s1924_s1 = inlined_call_operand.vmem [shape: f32[1,1,16], index: 1, kind: input, shape index: {}]   ;;  %s1925_s2 = inlined_call_operand.vmem [shape: f32[1,1,32], index: 2, kind: input, shape index: {}]   ;;  %s1926_s3 = inlined_call_operand.vmem [shape: f32[1,1,32], index: 3, kind: input, shape index: {}]   ;;  %s1927_s4 = inlined_call_operand.vmem [shape: f32[16,16], index: 4, kind: input, shape index: {}]   ;;  %s1928_s5 = inlined_call_operand.vmem [shape: f32[32,128], index: 5, kind: input, shape index: {}]   ;;  %s1929_s6 = inlined_call_operand.vmem [shape: f32[1,16,128], index: 6, kind: input, shape index: {}]   ;;  %s1930_s7 = inlined_call_operand.vmem [shape: f32[32,84], index: 7, kind: input, shape index: {}]   ;;  %s1931_s8 = inlined_call_operand.vmem [shape: f32[1,84], index: 8, kind: input, shape index: {}]   ;;  %s1932_s9 = inlined_call_operand.vmem [shape: f32[1,16,8], index: 9, kind: input, shape index: {}]   ;;  %s1933_s10 = inlined_call_operand.hbm [shape: f32[8,2,8], index: 10, kind: output, shape index: {}]  }
   0x1 LB: > { %s1580_s14 = sadd.s32 4294967295, %s1486_s13   ;;  %p1291_p0 = scmp.ge.s32.totalorder %s1486_s13, 1  ;;  %s1486_s13 = sphi %s1574_s13, %s21_s13  }
   0x2   : > { %p298_p1 = scmp.lt.s32.totalorder %s1486_s13, 9 }
   0x4   : > { %p299_p2 = pnand %p1291_p0, %p298_p1 }
   0x5   : > { %p1292_p3 = scmp.ne.s32.totalorder (!%p299_p2), %s1580_s14, 0 }
   0x6   : > { %302 = sbr.rel (%p299_p2) target bundleno = 2600 (0xa28), region = 60 }
   0xb   : > { %329 = sbr.rel (%p1292_p3) target bundleno = 26 (0x1a), region = 64 }
  0x10   : > { %v1350_v0 = vld [vmem:[%s1925_s2] ss:$0 sm:$0xff]  ;;  %vm334_vm0 = vcmask 254976   ;;  %vm343_vm1 = vcmask 130048   ;;  %v342_v3 = vld [vmem:[%s1927_s4 + $0x8] sm:$0xff]  ;;  %vm352_vm2 = vcmask 123904  }
  0x11   : > { %v1351_v1 = vld [vmem:[%s1926_s3] ss:$0 sm:$0xff]  ;;  %335 = vst.msk [vmem:[#allocation2] sm:$0x3] %vm334_vm0, %v1350_v0  ;;  %v1488_v5 = vmov 0.0  }
  0x12   : > { %v341_v2 = vld [vmem:[%s1927_s4] sm:$0xff]  ;;  %340 = vst.msk [vmem:[#allocation3] sm:$0x3] %vm334_vm0, %v1351_v1 }
  0x13   : > { %344 = vst.msk [vmem:[#allocation4] sm:$0xff] %vm343_vm1, %v341_v2  ;;  %v1352_v4 = vld [vmem:[%s1924_s1] ss:$0 sm:$0xff] }
  0x14   : > { %346 = vst.msk [vmem:[#allocation4 + $0x10] sm:$0xff] %vm343_vm1, %v341_v2 }
  0x15   : > { %345 = vst.msk [vmem:[#allocation4 + $0x8] sm:$0xff] %vm343_vm1, %v342_v3 }
  0x16   : > { %347 = vst.msk [vmem:[#allocation4 + $0x18] sm:$0xff] %vm343_vm1, %v342_v3 }
  0x17   : > { %353 = vst.msk [vmem:[#allocation5] sm:$0x3] %vm352_vm2, %v1352_v4 }
  0x18   : > { %354 = vst.msk [vmem:[#allocation6] sm:$0x3] %vm352_vm2, %v1488_v5 }
  0x19   : > { %355 = vst.msk [vmem:[#allocation7] sm:$0x3] %vm352_vm2, %v1488_v5 }
  0x1a PF: > { %v392_v6 = vld [vmem:[%s1928_s5 + $0x18] sm:$0xff]  ;;  %v361_v7 = vld [vmem:[%s1929_s6 + $0x8] sm:$0xff]  ;;  %v391_v8 = vld [vmem:[%s1928_s5 + $0x10] sm:$0xff]  ;;  %vm362_vm3 = vcmask 130048   ;;  %vm393_vm4 = vcmask 261120   ;;  %s1293_s19 = sshll.u32 %s1580_s14, 1 }
  0x1b   : > { %409 = vmatpush.msra.mxu1 %v392_v6  ;;  %380 = vmatpush.msra.mxu0 %v361_v7  ;;  %v360_v9 = vld [vmem:[%s1929_s6] sm:$0xff]  ;;  %v390_v11 = vld [vmem:[%s1928_s5 + $0x8] sm:$0xff]  ;;  %s357_s22 = scalar_lea.vmem %s1923_s0, %s1293_s19  ;;  %s1489_s23 = smov 64   ;;  %v473_v41 = vld [vmem:[%s1930_s7 + $0x18] sm:$0xff]  ;;  %vm463_vm9 = vcmask 254976   ;;  %vm604_vm10 = vcmask 123904  }
  0x1c   : > { %v389_v12 = vld [vmem:[%s1928_s5] sm:$0xff]  ;;  %s1490_s24 = smov 32   ;;  %v472_v42 = vld [vmem:[%s1930_s7 + $0x10] sm:$0xff]  ;;  %492 = vmatpush.msra.mxu2 %v473_v41  ;;  %v471_v43 = vld [vmem:[%s1930_s7 + $0x8] sm:$0xff]  ;;  %s1494_s17 = smov 106  }
  0x1d   : > { %410 = vmatpush.msra.mxu1 %v391_v8  ;;  %381 = vmatpush.msra.mxu0 %v360_v9  ;;  %v387_v13 = vld [vmem:[#allocation2] sm:$0x3]  ;;  %v388_v20 = vld [vmem:[#allocation3] sm:$0x3]  ;;  %v1646_v47 = vld [vmem:[#allocation4 + $0x10] sm:$0xff]  ;;  %s1495_s18 = smov 110  }
  0x1e   : > { %v359_v10 = vld [vmem:[#allocation5] sm:$0x3]  ;;  %v358_v14 = vld [vmem:[%s357_s22] sm:$0x3]  ;;  %493 = vmatpush.msra.mxu2 %v472_v42  ;;  %v1653_v50 = vadd.f32 1e-16, %v1646_v47 }
  0x1f   : > { %1294 = vmatmul.msk.f32.vlgmr.msra.gmra.mxu0 %vm362_vm3, %v359_v10  ;;  %411 = vmatpush.msra.mxu1 %v390_v11  ;;  %v470_v44 = vld [vmem:[%s1930_s7] sm:$0xff]  ;;  %v1681_v60 = vld [vmem:[#allocation4 + $0x8] sm:$0xff]  ;;  %s1498_s20 = smov 17   ;;  %s1499_s21 = smov 1  }
  0x20   : > { %494 = vmatpush.msra.mxu2 %v471_v43  ;;  %v1648_v48 = vld [vmem:[#allocation4 + $0x18] sm:$0xff]  ;;  %v1650_v49 = vld [vmem:[#allocation4] sm:$0xff]  ;;  %v589_v52 = vmul.f32 %v1653_v50, %v1653_v50  ;;  %v1684_v61 = vadd.f32 1e-16, %v1681_v60  ;;  %s1500_s22 = smov 113   ;;  %s1504_s25 = smov 127  }
  0x21   : > { %412 = vmatpush.msra.mxu1 %v389_v12  ;;  %v1656_v51 = vadd.f32 1e-16, %v1650_v49  ;;  %v1661_v53 = vadd.f32 1e-16, %v1648_v48  ;;  %v1379_v0 = vld [vmem:[%s1931_s8] ss:$0 sm:$0xff] }
  0x22   : > { %1295 = vmatmul.msk.f32.vlgmr.msra.gmra.mxu1 %vm393_vm4, %v387_v13  ;;  %495 = vmatpush.msra.mxu2 %v470_v44  ;;  %v1666_v55 = vsel %vm362_vm3, %v589_v52, 0.0  ;;  %v588_v62 = vmul.f32 %v1684_v61, %v1684_v61  ;;  %s1507_s26 = smov 88   ;;  %s1512_s11 = smov 76  }
  0x23   : > { %v587_v54 = vmul.f32 %v1656_v51, %v1656_v51  ;;  %v590_v57 = vmul.f32 %v1661_v53, %v1661_v53  ;;  %s1513_s12 = smov 96   ;;  %s1514_s15 = smov 84  }
  0x24   : > { %v1689_v63 = vsel %vm362_vm3, %v588_v62, 0.0  ;;  %s1515_s16 = smov 52   ;;  %p1309_p4 = scmp.eq.s32.totalorder %s1580_s14, 7 }
  0x25   : > { %v1669_v56 = vsel %vm362_vm3, %v587_v54, 0.0  ;;  %v1676_v58 = vsel %vm362_vm3, %v590_v57, 0.0 }
  0x9c   : > { %v383_v15 = vpop.f32.mrf.mxu0 }
  0x9d   : > { %v386_v16 = vadd.f32 %v383_v15, %v358_v14 }
  0x9f   : > { %v414_v17 = vpop.f32.mrf.mxu1 }
  0xa0   : > { %v417_v18 = vadd.f32 %v414_v17, %v386_v16 }
  0xa2   : > { %1380 = vtanh.f32 %v417_v18  ;;  %v1296_v21 = vmul.f32 -1.442695, %v417_v18 }
  0xa4   : > { %1382 = vpow2.f32 %v1296_v21 }
  0xa8   : > { %v1381_v19 = vpop.eup %1380 }
  0xa9   : > { %444 = vrot.lane.b32.xlu0 %v1381_v19, %s1489_s23 }
  0xaa   : > { %v1383_v22 = vpop.eup %1382 }
  0xab   : > { %v421_v23 = vadd.f32 1.0, %v1383_v22 }
  0xad   : > { %1384 = vrcp.f32 %v421_v23  ;;  %v433_v29 = vand.u32 2147483648, %v421_v23  ;;  %vm427_vm6 = vweird.f32 %v421_v23  ;;  %v431_v30 = vand.u32 2147483647, %v421_v23 }
  0xaf   : > { %v434_v32 = vor.u32 1.1754944e-38, %v433_v29  ;;  %vm432_vm8 = vcmp.eq.f32.partialorder %v431_v30, 8.507059e+37 }
  0xb1   : > { %439 = vrot.lane.b32.xlu0 %v388_v20, %s1490_s24 }
  0xb3   : > { %v1385_v24 = vpop.eup %1384 }
  0xb4   : > { %v423_v25 = vmul.f32 %v1385_v24, %v421_v23  ;;  %vm428_vm5 = vweird.f32 %v1385_v24 }
  0xb5   : > { %vm429_vm7 = vmor %vm427_vm6, %vm428_vm5 }
  0xb6   : > { %v424_v26 = vsub.f32 1.0, %v423_v25  ;;  %v1491_v25 = vmov 0  }
  0xb7   : > { %1355 = vset.pattern.permute.xlu0 %v1491_v25  ;;  %1354 = vset.pattern.permute.xlu2 %v1491_v25 }
  0xb8   : > { %v425_v27 = vmul.f32 %v1385_v24, %v424_v26  ;;  %1353 = vset.pattern.permute.xlu1 %v1491_v25 }
  0xba   : > { %v426_v28 = vadd.f32 %v1385_v24, %v425_v27 }
  0xbc   : > { %v430_v31 = vsel %vm429_vm7, %v1385_v24, %v426_v28 }
  0xbd   : > { %v435_v34 = vsel %vm432_vm8, %v434_v32, %v430_v31 }
  0xdb   : > { %592 = vadd.xlane.f32.xlu0 %v1669_v56 }
 0x11b   : > { %v445_v33 = vpop.permute.xlu0 %444 }
 0x11c   : > { %v447_v35 = vmul.f32 %v445_v33, %v435_v34 }
 0x11e   : > { %449 = vrot.lane.b32.xlu1 %v447_v35, %s1490_s24 }
 0x123   : > { %v440_v36 = vpop.permute.xlu0 %439 }
 0x124   : > { %v442_v37 = vmul.f32 %v440_v36, %v435_v34 }
 0x14e   : > { %v593_v18 = vpop.xlane.xlu0 %592 }
 0x14f   : > { %v608_v22 = vmax.f32 %v593_v18, 1e-16 }
 0x151   : > { %vm618_vm15 = vweird.f32 %v608_v22 }
 0x190   : > { %v450_v38 = vpop.permute.xlu1 %449 }
 0x191   : > { %v1629_v39 = vadd.f32 %v450_v38, %v442_v37 }
 0x193   : > { %1386 = vtanh.f32 %v1629_v39 }
 0x199   : > { %v1387_v40 = vpop.eup %1386 }
 0x19a   : > { %455 = vrot.lane.b32.xlu1 %v1387_v40, %s1489_s23  ;;  %s1503_s23 = smov 126  }
 0x1c4   : > { %595 = vadd.xlane.f32.xlu1 %v1689_v63 }
 0x20c   : > { %v456_v45 = vpop.permute.xlu1 %455 }
 0x20d   : > { %v458_v46 = vmul.f32 %v456_v45, %v435_v34 }
 0x20f   : > { %460 = vrot.lane.b32.xlu2 %v458_v46, %s1490_s24 }
 0x237   : > { %v596_v19 = vpop.xlane.xlu1 %595 }
 0x238   : > { %598 = vadd.xlane.f32.xlu2 %v1666_v55  ;;  %v609_v20 = vmax.f32 %v596_v19, 1e-16 }
 0x23a   : > { %1388 = vrsqrt.f32 %v609_v20  ;;  %vm628_vm13 = vweird.f32 %v609_v20 }
 0x240   : > { %601 = vadd.xlane.f32.xlu2 %v1676_v58  ;;  %v1389_v27 = vpop.eup %1388 }
 0x241   : > { %v623_v31 = vmul.f32 %v1389_v27, %v609_v20  ;;  %vm629_vm14 = vweird.f32 %v1389_v27 }
 0x243   : > { %v624_v36 = vmul.f32 %v1389_v27, %v623_v31 }
 0x245   : > { %v625_v41 = vmul.f32 0.5, %v624_v36 }
 0x247   : > { %v626_v46 = vsub.f32 1.5, %v625_v41  ;;  %v1493_v41 = vmov 17  }
 0x269   : > { %v461_v59 = vpop.permute.xlu2 %460 }
 0x26a   : > { %464 = vst.msk [vmem:[#allocation2] sm:$0x3] %vm463_vm9, %v461_v59  ;;  %1297 = vmatmul.msk.f32.vlgmr.msra.gmra.mxu2 %vm393_vm4, %v461_v59  ;;  %vm1728_vm4 = vmor %vm628_vm13, %vm629_vm14 }
 0x2ab   : > { %v599_v17 = vpop.xlane.xlu2 %598 }
 0x2ac   : > { %v610_v21 = vmax.f32 %v599_v17, 1e-16 }
 0x2ae   : > { %1390 = vrsqrt.f32 %v610_v21  ;;  %vm638_vm11 = vweird.f32 %v610_v21 }
 0x2af   : > { %1392 = vrsqrt.f32 %v608_v22 }
 0x2b3   : > { %v1719_v24 = vpop.xlane.xlu2 %601 }
 0x2b4   : > { %v1391_v28 = vpop.eup %1390 }
 0x2b5   : > { %v1393_v30 = vpop.eup %1392  ;;  %v633_v33 = vmul.f32 %v1391_v28, %v610_v21  ;;  %vm639_vm12 = vweird.f32 %v1391_v28 }
 0x2b6   : > { %v613_v35 = vmul.f32 %v1393_v30, %v608_v22  ;;  %vm619_vm0 = vweird.f32 %v1393_v30  ;;  %vm1724_vm2 = vmor %vm638_vm11, %vm639_vm12  ;;  %vm537_vm12 = vcmask 165008  }
 0x2b7   : > { %v634_v37 = vmul.f32 %v1391_v28, %v633_v33  ;;  %vm620_vm6 = vmor %vm618_vm15, %vm619_vm0 }
 0x2b8   : > { %v614_v38 = vmul.f32 %v1393_v30, %v613_v35 }
 0x2b9   : > { %v635_v43 = vmul.f32 0.5, %v634_v37  ;;  %v1492_v37 = vmov 16  }
 0x2ba   : > { %v615_v44 = vmul.f32 0.5, %v614_v38 }
 0x2bb   : > { %v636_v57 = vsub.f32 1.5, %v635_v43 }
 0x2bc   : > { %v616_v59 = vsub.f32 1.5, %v615_v44  ;;  %v611_v44 = vmax.f32 %v1719_v24, 1e-16 }
 0x2be   : > { %vm648_vm0 = vweird.f32 %v611_v44 }
 0x2ed   : > { %v497_v1 = vpop.f32.mrf.mxu2 }
 0x2ee   : > { %v1695_v2 = vadd.f32 %v1379_v0, %v497_v1  ;;  %v627_v1 = vmul.f32 %v1389_v27, %v626_v46 }
 0x2f0   : > { %v564_v3 = vadd.f32 1e-16, %v1695_v2  ;;  %v503_v23 = vand.u32 2147483647, %v1695_v2  ;;  %v500_v35 = vmax.f32 %v1695_v2, 0.0  ;;  %vm501_vm11 = vcmp.ne.f32.partialorder %v1695_v2, %v1695_v2 }
 0x2f2   : > { %v1698_v4 = vmul.f32 %v564_v3, %v564_v3  ;;  %v1700_v5 = vperm.slane %v564_v3, 0  ;;  %v566_v6 = vrot.slane %v564_v3, 1  ;;  %v504_v26 = vsub.f32 0.0, %v503_v23 }
 0x2f4   : > { %v605_v7 = vsel %vm604_vm10, %v1698_v4, 0.0  ;;  %v572_v8 = vmul.f32 %v1700_v5, %v1684_v61  ;;  %v571_v9 = vmul.f32 %v1700_v5, %v1656_v51  ;;  %v1708_v10 = vperm.slane %v566_v6, 0 }
 0x2f5   : > { %606 = vadd.xlane.f32.xlu2 %v605_v7  ;;  %v505_v29 = vmul.f32 1.442695, %v504_v26  ;;  %v617_v7 = vmul.f32 %v1393_v30, %v616_v59 }
 0x2f6   : > { %v578_v11 = vsel %vm362_vm3, %v572_v8, 0.0  ;;  %v575_v12 = vsel %vm362_vm3, %v571_v9, 0.0  ;;  %v573_v13 = vmul.f32 %v1708_v10, %v1653_v50  ;;  %v574_v14 = vmul.f32 %v1708_v10, %v1661_v53 }
 0x2f7   : > { %579 = vadd.xlane.f32.xlu1 %v578_v11  ;;  %576 = vadd.xlane.f32.xlu0 %v575_v12  ;;  %1394 = vpow2.f32 %v505_v29  ;;  %v637_v9 = vmul.f32 %v1391_v28, %v636_v57  ;;  %v621_v17 = vsel %vm620_vm6, %v1393_v30, %v617_v7  ;;  %vm707_vm6 = vcmask 1041409  }
 0x2f8   : > { %v581_v15 = vsel %vm362_vm3, %v573_v13, 0.0  ;;  %v584_v16 = vsel %vm362_vm3, %v574_v14, 0.0  ;;  %v631_v13 = vsel %vm1728_vm4, %v1389_v27, %v627_v1 }
 0x2f9   : > { %v641_v18 = vsel %vm1724_vm2, %v1391_v28, %v637_v9 }
 0x2fd   : > { %582 = vadd.xlane.f32.xlu2 %v581_v15  ;;  %v1395_v40 = vpop.eup %1394 }
 0x2fe   : > { %v507_v54 = vadd.f32 1.0, %v1395_v40  ;;  %v510_v11 = vmul.f32 -0.5, %v1395_v40  ;;  %v513_v31 = vand.u32 2147483647, %v1395_v40 }
 0x2ff   : > { %585 = vadd.xlane.f32.xlu0 %v584_v16 }
 0x300   : > { %v511_v23 = vadd.f32 1.0, %v510_v11  ;;  %vm514_vm8 = vcmp.lt.f32.partialorder %v513_v31, 0.0004427343 }
 0x302   : > { %v512_v30 = vmul.f32 %v1395_v40, %v511_v23  ;;  %v1298_v40 = vmul.f32 -1.442695, %v1695_v2 }
 0x368   : > { %v607_v32 = vpop.xlane.xlu2 %606 }
 0x369   : > { %v652_v34 = vmax.f32 %v607_v32, 1e-16 }
 0x36a   : > { %v577_v19 = vpop.xlane.xlu0 %576  ;;  %v580_v26 = vpop.xlane.xlu1 %579 }
 0x36b   : > { %1396 = vrsqrt.f32 %v652_v34  ;;  %vm659_vm5 = vweird.f32 %v652_v34 }
 0x36c   : > { %1398 = vlog2.f32 %v507_v54 }
 0x36d   : > { %1400 = vpow2.f32 %v1298_v40 }
 0x370   : > { %v583_v29 = vpop.xlane.xlu2 %582 }
 0x371   : > { %v1397_v42 = vpop.eup %1396 }
 0x372   : > { %v654_v45 = vmul.f32 %v1397_v42, %v652_v34  ;;  %vm660_vm1 = vweird.f32 %v1397_v42  ;;  %v1399_v16 = vpop.eup %1398 }
 0x373   : > { %vm661_vm7 = vmor %vm659_vm5, %vm660_vm1  ;;  %v509_v34 = vmul.f32 0.6931472, %v1399_v16  ;;  %v586_v16 = vpop.xlane.xlu0 %585  ;;  %vm702_vm5 = vcmask 130112  }
 0x374   : > { %v655_v52 = vmul.f32 %v1397_v42, %v654_v45  ;;  %v538_v45 = vsel %vm537_vm12, %v1695_v2, -inf }
 0x375   : > { %v515_v28 = vsel %vm514_vm8, %v512_v30, %v509_v34 }
 0x376   : > { %v656_v62 = vmul.f32 0.5, %v655_v52  ;;  %v516_v36 = vadd.f32 %v515_v28, %v500_v35 }
 0x378   : > { %v657_v0 = vsub.f32 1.5, %v656_v62  ;;  %v1746_v38 = vsel %vm501_vm11, %v1695_v2, %v516_v36 }
 0x37a   : > { %v658_v8 = vmul.f32 %v1397_v42, %v657_v0 }
 0x37c   : > { %v1732_v12 = vsel %vm661_vm7, %v1397_v42, %v658_v8  ;;  %v1401_v42 = vpop.eup %1400  ;;  %vm548_vm7 = vcmask 17408  }
 0x37d   : > { %v664_v14 = vperm.slane %v1732_v12, 0  ;;  %v665_v15 = vperm.slane %v1732_v12, 1  ;;  %v521_v43 = vadd.f32 1.0, %v1401_v42  ;;  %v697_v12 = vlaneseq }
 0x37f   : > { %v668_v20 = vmul.f32 %v664_v14, %v621_v17  ;;  %v669_v21 = vmul.f32 %v664_v14, %v631_v13  ;;  %v670_v22 = vmul.f32 %v665_v15, %v641_v18  ;;  %1402 = vrcp.f32 %v521_v43 }
 0x380   : > { %1404 = vrsqrt.f32 %v611_v44  ;;  %v533_v3 = vand.u32 2147483648, %v521_v43  ;;  %vm527_vm14 = vweird.f32 %v521_v43  ;;  %v531_v24 = vand.u32 2147483647, %v521_v43 }
 0x381   : > { %v672_v27 = vmul.f32 %v668_v20, %v577_v19  ;;  %v673_v32 = vmul.f32 %v669_v21, %v580_v26  ;;  %v674_v33 = vmul.f32 %v670_v22, %v583_v29  ;;  %v1770_v26 = vand.u32 127, %v697_v12 }
 0x382   : > { %v534_v8 = vor.u32 1.1754944e-38, %v533_v3  ;;  %vm532_vm2 = vcmp.eq.f32.partialorder %v531_v24, 8.507059e+37 }
 0x383   : > { %686 = vperm.xlu1 %1353, %v672_v27   ;;  %692 = vperm.xlu0 %1355, %v674_v33   ;;  %v1773_v31 = vadd.s32 4294967288, %v1770_v26 }
 0x384   : > { %689 = vperm.xlu2 %1354, %v673_v32  }
 0x385   : > { %v1403_v46 = vpop.eup %1402 }
 0x386   : > { %v1405_v52 = vpop.eup %1404  ;;  %v523_v54 = vmul.f32 %v1403_v46, %v521_v43  ;;  %vm528_vm13 = vweird.f32 %v1403_v46 }
 0x387   : > { %v643_v57 = vmul.f32 %v1405_v52, %v611_v44  ;;  %vm529_vm15 = vmor %vm527_vm14, %vm528_vm13  ;;  %vm649_vm1 = vweird.f32 %v1405_v52 }
 0x388   : > { %v524_v59 = vsub.f32 1.0, %v523_v54  ;;  %vm650_vm4 = vmor %vm648_vm0, %vm649_vm1 }
 0x389   : > { %v644_v62 = vmul.f32 %v1405_v52, %v643_v57 }
 0x38b   : > { %1357 = vset.pattern.permute.xlu1 %v1493_v41  ;;  %1358 = vset.pattern.permute.xlu0 %v1493_v41  ;;  %v645_v0 = vmul.f32 0.5, %v644_v62 }
 0x38c   : > { %1356 = vset.pattern.permute.xlu2 %v1492_v37 }
 0x38d   : > { %678 = vperm.xlu2 %1356, %v1746_v38   ;;  %v646_v6 = vsub.f32 1.5, %v645_v0 }
 0x38f   : > { %v647_v9 = vmul.f32 %v1405_v52, %v646_v6 }
 0x391   : > { %v651_v13 = vsel %vm650_vm4, %v1405_v52, %v647_v9  ;;  %vm746_vm4 = vcmask 7168  }
 0x392   : > { %v671_v14 = vmul.f32 %v665_v15, %v651_v13 }
 0x394   : > { %v675_v17 = vmul.f32 %v671_v14, %v586_v16 }
 0x395   : > { %944 = vrot.lane.b32.xlu2 %v1698_v4, %s1494_s17  ;;  %v525_v4 = vmul.f32 %v1403_v46, %v524_v59 }
 0x397   : > { %v526_v1 = vadd.f32 %v1403_v46, %v525_v4  ;;  %v1497_v4 = vmov 19  }
 0x398   : > { %1360 = vset.pattern.permute.xlu2 %v1497_v4 }
 0x399   : > { %v530_v7 = vsel %vm529_vm15, %v1403_v46, %v526_v1 }
 0x39a   : > { %v1754_v11 = vsel %vm532_vm2, %v534_v8, %v530_v7 }
 0x39b   : > { %v728_v23 = vsub.f32 1.0, %v1754_v11 }
 0x3ad   : > { %539 = vmax.xlane.f32.xlu1 %v538_v45 }
 0x3c6   : > { %724 = vperm.xlu1 %1357, %v1754_v11  }
 0x3ce   : > { %1359 = vset.pattern.permute.xlu1 %v1491_v25 }
 0x3cf   : > { %695 = vperm.xlu1 %1359, %v675_v17  }
 0x3de   : > { %v690_v29 = vpop.permute.xlu2 %689 }
 0x3df   : > { %v701_v34 = vperm.slane %v690_v29, %v1773_v31 }
 0x3e7   : > { %v679_v37 = vpop.permute.xlu2 %678 }
 0x3ef   : > { %v945_v43 = vpop.permute.xlu2 %944 }
 0x3f0   : > { %v947_v44 = vsel %vm604_vm10, %v945_v43, 0.0 }
 0x3f5   : > { %v687_v18 = vpop.permute.xlu1 %686  ;;  %v693_v27 = vpop.permute.xlu0 %692 }
 0x3f6   : > { %v699_v32 = vperm.slane %v687_v18, %v1770_v26  ;;  %v704_v30 = vperm.slane %v693_v27, %v1770_v26 }
 0x3f8   : > { %v703_v35 = vsel %vm702_vm5, %v701_v34, %v699_v32 }
 0x420   : > { %v540_v19 = vpop.xlane.xlu1 %539 }
 0x421   : > { %v541_v20 = vsub.f32 %v1695_v2, %v540_v19 }
 0x423   : > { %v542_v21 = vmul.f32 1.442695, %v541_v20 }
 0x425   : > { %1406 = vpow2.f32 %v542_v21 }
 0x42b   : > { %v1761_v22 = vpop.eup %1406 }
 0x42c   : > { %545 = vrot.lane.b32.xlu0 %v1761_v22, %s1495_s18  ;;  %s1517_s18 = smov [#allocation8]  }
 0x434   : > { %731 = vperm.xlu0 %1358, %v728_v23  }
 0x438   : > { %v1767_v15 = vpop.permute.xlu1 %724 }
 0x441   : > { %v696_v33 = vpop.permute.xlu1 %695 }
 0x442   : > { %v705_v28 = vperm.slane %v696_v33, %v1773_v31 }
 0x444   : > { %v706_v36 = vsel %vm702_vm5, %v705_v28, %v704_v30 }
 0x445   : > { %v708_v41 = vsel %vm707_vm6, %v706_v36, %v703_v35  ;;  %v555_v36 = vld [vmem:[#allocation6] sm:$0x3] }
 0x446   : > { %v710_v40 = vmul.f32 %v708_v41, %v679_v37 }
 0x448   : > { %v711_v42 = vsel %vm604_vm10, %v710_v40, -inf }
 0x449   : > { %712 = vmax.xlane.f32.xlu2 %v711_v42 }
 0x45e   : > { %935 = vadd.xlane.f32.xlu0 %v1689_v63 }
 0x461   : > { %905 = vrot.lane.b32.xlu2 %v1700_v5, %s1494_s17 }
 0x48a   : > { %948 = vadd.xlane.f32.xlu2 %v947_v44 }
 0x492   : > { %938 = vadd.xlane.f32.xlu2 %v1666_v55 }
 0x49e   : > { %v546_v45 = vpop.permute.xlu0 %545 }
 0x49f   : > { %v549_v46 = vsel %vm548_vm7, %v546_v45, 0.0 }
 0x4a0   : > { %550 = vadd.xlane.f32.xlu1 %v549_v46 }
 0x4a6   : > { %v732_v34 = vpop.permute.xlu0 %731 }
 0x4a7   : > { %v734_v41 = vmul.f32 %v732_v34, %v555_v36 }
 0x4b9   : > { %907 = vrot.lane.b32.xlu1 %v1708_v10, %s1494_s17  ;;  %v1496_v10 = vmov 20   ;;  %s1516_s17 = smov 68  }
 0x4ba   : > { %1361 = vset.pattern.permute.xlu1 %v1496_v10 }
 0x4bc   : > { %v713_v52 = vpop.xlane.xlu2 %712 }
 0x4bd   : > { %v714_v54 = vsub.f32 %v710_v40, %v713_v52 }
 0x4bf   : > { %v715_v63 = vmul.f32 1.442695, %v714_v54 }
 0x4c1   : > { %1408 = vpow2.f32 %v715_v63 }
 0x4c4   : > { %v1791_v57 = vpop.permute.xlu2 %905 }
 0x4c5   : > { %v911_v5 = vmul.f32 %v1791_v57, %v1656_v51  ;;  %v912_v46 = vmul.f32 %v1791_v57, %v1684_v61 }
 0x4c7   : > { %v1409_v59 = vpop.eup %1408  ;;  %v915_v55 = vsel %vm362_vm3, %v911_v5, 0.0  ;;  %v918_v63 = vsel %vm362_vm3, %v912_v46, 0.0 }
 0x4c8   : > { %916 = vadd.xlane.f32.xlu2 %v915_v55  ;;  %v717_v62 = vsel %vm604_vm10, %v1409_v59, 0.0 }
 0x4c9   : > { %718 = vadd.xlane.f32.xlu0 %v717_v62 }
 0x4d1   : > { %v1808_v30 = vpop.xlane.xlu0 %935 }
 0x4e3   : > { %932 = vadd.xlane.f32.xlu1 %v1669_v56 }
 0x4eb   : > { %941 = vadd.xlane.f32.xlu1 %v1676_v58 }
 0x4fd   : > { %v949_v0 = vpop.xlane.xlu2 %948 }
 0x4fe   : > { %v994_v1 = vmax.f32 %v949_v0, 1e-16 }
 0x500   : > { %1410 = vrsqrt.f32 %v994_v1  ;;  %vm1001_vm11 = vweird.f32 %v994_v1 }
 0x505   : > { %v939_v3 = vpop.xlane.xlu2 %938 }
 0x506   : > { %v1411_v51 = vpop.eup %1410  ;;  %v952_v6 = vmax.f32 %v939_v3, 1e-16  ;;  %v1502_v3 = vmov 21  }
 0x507   : > { %v996_v24 = vmul.f32 %v1411_v51, %v994_v1  ;;  %vm1002_vm8 = vweird.f32 %v1411_v51  ;;  %1363 = vset.pattern.permute.xlu0 %v1502_v3 }
 0x508   : > { %1412 = vrsqrt.f32 %v952_v6  ;;  %vm980_vm12 = vweird.f32 %v952_v6  ;;  %vm1003_vm14 = vmor %vm1001_vm11, %vm1002_vm8  ;;  %vm748_vm8 = vcmask 138240  }
 0x509   : > { %v997_v7 = vmul.f32 %v1411_v51, %v996_v24 }
 0x50b   : > { %v998_v8 = vmul.f32 0.5, %v997_v7 }
 0x50d   : > { %v999_v9 = vsub.f32 1.5, %v998_v8 }
 0x50e   : > { %v1413_v13 = vpop.eup %1412 }
 0x50f   : > { %v975_v14 = vmul.f32 %v1413_v13, %v952_v6  ;;  %v1000_v56 = vmul.f32 %v1411_v51, %v999_v9  ;;  %vm981_vm13 = vweird.f32 %v1413_v13 }
 0x510   : > { %vm982_vm15 = vmor %vm980_vm12, %vm981_vm13 }
 0x511   : > { %v976_v58 = vmul.f32 %v1413_v13, %v975_v14  ;;  %v1799_v18 = vsel %vm1003_vm14, %v1411_v51, %v1000_v56 }
 0x512   : > { %v1007_v21 = vperm.slane %v1799_v18, 1  ;;  %v1006_v61 = vperm.slane %v1799_v18, 0 }
 0x513   : > { %v977_v16 = vmul.f32 0.5, %v976_v58  ;;  %v551_v17 = vpop.xlane.xlu1 %550 }
 0x514   : > { %1414 = vrcp.f32 %v551_v17 }
 0x515   : > { %v978_v19 = vsub.f32 1.5, %v977_v16  ;;  %v1829_v16 = vadd.f32 1.0, %v1746_v38 }
 0x517   : > { %v979_v20 = vmul.f32 %v1413_v13, %v978_v19 }
 0x519   : > { %v983_v29 = vsel %vm982_vm15, %v1413_v13, %v979_v20 }
 0x51a   : > { %v1415_v27 = vpop.eup %1414  ;;  %v1804_v32 = vmul.f32 %v1007_v21, %v983_v29  ;;  %v1505_v29 = vmov 38  }
 0x51b   : > { %v553_v33 = vmul.f32 %v1415_v27, %v1761_v22  ;;  %v1501_v22 = vmov 18  }
 0x51d   : > { %767 = vperm.xlu1 %1361, %v553_v33   ;;  %757 = vperm.xlu2 %1360, %v553_v33  }
 0x525   : > { %1365 = vset.pattern.permute.xlu2 %v1491_v25  ;;  %1362 = vset.pattern.permute.xlu1 %v1501_v22 }
 0x52b   : > { %v908_v43 = vpop.permute.xlu1 %907 }
 0x52c   : > { %v913_v52 = vmul.f32 %v908_v43, %v1653_v50 }
 0x52e   : > { %v921_v5 = vsel %vm362_vm3, %v913_v52, 0.0 }
 0x53b   : > { %v917_v0 = vpop.xlane.xlu2 %916 }
 0x53c   : > { %v719_v28 = vpop.xlane.xlu0 %718 }
 0x53d   : > { %1416 = vrcp.f32 %v719_v28 }
 0x543   : > { %v1417_v35 = vpop.eup %1416 }
 0x544   : > { %v721_v37 = vmul.f32 %v1417_v35, %v1409_v59 }
 0x546   : > { %v727_v40 = vmul.f32 %v1767_v15, %v721_v37  ;;  %v914_v15 = vmul.f32 %v908_v43, %v1661_v53 }
 0x548   : > { %v735_v42 = vadd.f32 %v734_v41, %v727_v40  ;;  %v924_v54 = vsel %vm362_vm3, %v914_v15, 0.0 }
 0x54a   : > { %743 = vrot.lane.b32.xlu0 %v735_v42, %s1498_s20  ;;  %740 = vrot.lane.b32.xlu1 %v735_v42, %s1499_s21 }
 0x54b   : > { %737 = vrot.lane.b32.xlu2 %v735_v42, %s1500_s22 }
 0x556   : > { %v933_v44 = vpop.xlane.xlu1 %932 }
 0x557   : > { %v950_v45 = vmax.f32 %v933_v44, 1e-16 }
 0x559   : > { %1418 = vrsqrt.f32 %v950_v45  ;;  %vm960_vm0 = vweird.f32 %v950_v45 }
 0x55e   : > { %v942_v51 = vpop.xlane.xlu1 %941 }
 0x55f   : > { %v1419_v59 = vpop.eup %1418  ;;  %v953_v17 = vmax.f32 %v942_v51, 1e-16 }
 0x560   : > { %v955_v55 = vmul.f32 %v1419_v59, %v950_v45  ;;  %vm961_vm1 = vweird.f32 %v1419_v59 }
 0x561   : > { %vm962_vm2 = vmor %vm960_vm0, %vm961_vm1  ;;  %vm990_vm14 = vweird.f32 %v953_v17  ;;  %vm880_vm1 = vcmask 345408  }
 0x562   : > { %v956_v62 = vmul.f32 %v1419_v59, %v955_v55 }
 0x564   : > { %v957_v10 = vmul.f32 0.5, %v956_v62 }
 0x566   : > { %v958_v4 = vsub.f32 1.5, %v957_v10 }
 0x568   : > { %v959_v53 = vmul.f32 %v1419_v59, %v958_v4 }
 0x56a   : > { %v963_v50 = vsel %vm962_vm2, %v1419_v59, %v959_v53 }
 0x56b   : > { %v1010_v57 = vmul.f32 %v1006_v61, %v963_v50 }
 0x56d   : > { %v1014_v1 = vmul.f32 %v1010_v57, %v917_v0 }
 0x574   : > { %925 = vadd.xlane.f32.xlu2 %v924_v54  ;;  %919 = vadd.xlane.f32.xlu1 %v918_v63  ;;  %v881_v63 = vsel %vm880_vm1, %v1695_v2, -inf }
 0x575   : > { %922 = vadd.xlane.f32.xlu0 %v921_v5 }
 0x577   : > { %v758_v6 = vpop.permute.xlu2 %757 }
 0x58d   : > { %752 = vperm.xlu1 %1362, %v553_v33  }
 0x58f   : > { %v768_v24 = vpop.permute.xlu1 %767 }
 0x595   : > { %1364 = vset.pattern.permute.xlu1 %v1491_v25  ;;  %v951_v25 = vmax.f32 %v1808_v30, 1e-16 }
 0x596   : > { %1027 = vperm.xlu1 %1364, %v1014_v1  }
 0x597   : > { %1420 = vrsqrt.f32 %v951_v25  ;;  %vm970_vm11 = vweird.f32 %v951_v25 }
 0x598   : > { %1422 = vrsqrt.f32 %v953_v17 }
 0x59d   : > { %v1421_v19 = vpop.eup %1420 }
 0x59e   : > { %v965_v20 = vmul.f32 %v1421_v19, %v951_v25  ;;  %v1423_v33 = vpop.eup %1422  ;;  %vm971_vm12 = vweird.f32 %v1421_v19 }
 0x59f   : > { %v985_v28 = vmul.f32 %v1423_v33, %v953_v17  ;;  %vm972_vm13 = vmor %vm970_vm11, %vm971_vm12  ;;  %vm991_vm15 = vweird.f32 %v1423_v33 }
 0x5a0   : > { %v966_v27 = vmul.f32 %v1421_v19, %v965_v20  ;;  %vm992_vm0 = vmor %vm990_vm14, %vm991_vm15 }
 0x5a1   : > { %v986_v30 = vmul.f32 %v1423_v33, %v985_v28 }
 0x5a2   : > { %v967_v34 = vmul.f32 0.5, %v966_v27 }
 0x5a3   : > { %v987_v36 = vmul.f32 0.5, %v986_v30 }
 0x5a4   : > { %v968_v35 = vsub.f32 1.5, %v967_v34 }
 0x5a5   : > { %v738_v7 = vpop.permute.xlu2 %737  ;;  %v988_v41 = vsub.f32 1.5, %v987_v36 }
 0x5a6   : > { %v969_v37 = vmul.f32 %v1421_v19, %v968_v35 }
 0x5a7   : > { %v989_v22 = vmul.f32 %v1423_v33, %v988_v41 }
 0x5a8   : > { %v973_v40 = vsel %vm972_vm13, %v1421_v19, %v969_v37  ;;  %v1506_v19 = vmov 39  }
 0x5a9   : > { %v1011_v42 = vmul.f32 %v1006_v61, %v973_v40  ;;  %v993_v46 = vsel %vm992_vm0, %v1423_v33, %v989_v22 }
 0x5aa   : > { %v1013_v52 = vmul.f32 %v1007_v21, %v993_v46 }
 0x5bc   : > { %v744_v8 = vpop.permute.xlu0 %743  ;;  %v741_v9 = vpop.permute.xlu1 %740 }
 0x5bd   : > { %v747_v13 = vsel %vm746_vm4, %v738_v7, %v741_v9 }
 0x5be   : > { %v749_v14 = vsel %vm748_vm8, %v747_v13, %v744_v8 }
 0x5bf   : > { %v770_v56 = vmul.f32 %v768_v24, %v749_v14  ;;  %v760_v58 = vmul.f32 %v758_v6, %v749_v14 }
 0x5c1   : > { %772 = vrot.lane.b32.xlu2 %v770_v56, %s1503_s23  ;;  %762 = vrot.lane.b32.xlu0 %v760_v58, %s1504_s25 }
 0x5c9   : > { %781 = vperm.xlu0 %1363, %v1829_v16  }
 0x5d1   : > { %1366 = vset.pattern.permute.xlu0 %v1505_v29 }
 0x5d2   : > { %1019 = vperm.xlu0 %1366, %v1746_v38  }
 0x5e7   : > { %v920_v43 = vpop.xlane.xlu1 %919  ;;  %v926_v15 = vpop.xlane.xlu2 %925 }
 0x5e8   : > { %v923_v38 = vpop.xlane.xlu0 %922  ;;  %v1015_v44 = vmul.f32 %v1011_v42, %v920_v43  ;;  %v1017_v54 = vmul.f32 %v1013_v52, %v926_v15  ;;  %v852_v52 = vld [vmem:[%s1932_s9 + $0x8] sm:$0xff] }
 0x5e9   : > { %v1016_v45 = vmul.f32 %v1804_v32, %v923_v38  ;;  %869 = vmatpush.msra.mxu3 %v852_v52 }
 0x5ea   : > { %1030 = vperm.xlu2 %1365, %v1015_v44  }
 0x5eb   : > { %1033 = vperm.xlu1 %1364, %v1016_v45  }
 0x5f2   : > { %1036 = vperm.xlu2 %1365, %v1017_v54   ;;  %v851_v54 = vld [vmem:[%s1932_s9] sm:$0xff] }
 0x5f3   : > { %870 = vmatpush.msra.mxu3 %v851_v54 }
 0x5fa   : > { %1369 = vset.pattern.permute.xlu2 %v1506_v19 }
 0x5ff   : > { %v753_v5 = vpop.permute.xlu1 %752 }
 0x600   : > { %v755_v59 = vmul.f32 %v753_v5, %v749_v14 }
 0x608   : > { %v1028_v3 = vpop.permute.xlu1 %1027 }
 0x609   : > { %v1038_v7 = vperm.slane %v1028_v3, %v1770_v26 }
 0x615   : > { %882 = vmax.xlane.f32.xlu1 %v881_v63  ;;  %v896_v63 = vld [vmem:[#allocation7] sm:$0x3] }
 0x61b   : > { %v773_v10 = vpop.permute.xlu2 %772 }
 0x633   : > { %v763_v55 = vpop.permute.xlu0 %762 }
 0x634   : > { %v765_v62 = vadd.f32 %v763_v55, %v755_v59 }
 0x636   : > { %v775_v4 = vadd.f32 %v773_v10, %v765_v62 }
 0x638   : > { %v776_v32 = vmax.f32 %v775_v4, 1e-30 }
 0x63a   : > { %1424 = vlog2.f32 %v776_v32 }
 0x63b   : > { %v782_v61 = vpop.permute.xlu0 %781 }
 0x640   : > { %v1425_v53 = vpop.eup %1424 }
 0x641   : > { %v778_v50 = vmul.f32 0.6931472, %v1425_v53 }
 0x643   : > { %v784_v57 = vmul.f32 %v782_v61, %v778_v50 }
 0x644   : > { %v1031_v1 = vpop.permute.xlu2 %1030  ;;  %v1020_v56 = vpop.permute.xlu0 %1019 }
 0x645   : > { %v785_v18 = vmul.f32 1.442695, %v784_v57  ;;  %v1039_v6 = vperm.slane %v1031_v1, %v1773_v31 }
 0x647   : > { %1426 = vpow2.f32 %v785_v18  ;;  %v1040_v13 = vsel %vm702_vm5, %v1039_v6, %v1038_v7 }
 0x64c   : > { %v1037_v51 = vpop.permute.xlu2 %1036 }
 0x64d   : > { %v1427_v21 = vpop.eup %1426  ;;  %v1042_v8 = vperm.slane %v1037_v51, %v1773_v31 }
 0x64e   : > { %v787_v0 = vsel %vm604_vm10, %v1427_v21, 0.0 }
 0x64f   : > { %788 = vadd.xlane.f32.xlu0 %v787_v0 }
 0x65d   : > { %v1034_v24 = vpop.permute.xlu1 %1033 }
 0x65e   : > { %v1041_v9 = vperm.slane %v1034_v24, %v1770_v26  ;;  %v796_v26 = vshrl.u32 %v697_v12, 7 }
 0x660   : > { %v1043_v14 = vsel %vm702_vm5, %v1042_v8, %v1041_v9  ;;  %v1852_v33 = vadd.s32 8, %v796_v26  ;;  %1367 = vset.pattern.permute.xlu1 %v796_v26 }
 0x661   : > { %v1044_v58 = vsel %vm707_vm6, %v1043_v14, %v1040_v13 }
 0x662   : > { %v1046_v25 = vmul.f32 %v1044_v58, %v1020_v56  ;;  %1368 = vset.pattern.permute.xlu0 %v1852_v33  ;;  %v1508_v56 = vmov 42   ;;  %v1509_v58 = vmov 41  }
 0x664   : > { %v1047_v17 = vsel %vm604_vm10, %v1046_v25, -inf }
 0x665   : > { %1048 = vmax.xlane.f32.xlu2 %v1047_v17 }
 0x688   : > { %v883_v20 = vpop.xlane.xlu1 %882 }
 0x689   : > { %v884_v29 = vsub.f32 %v1695_v2, %v883_v20 }
 0x68b   : > { %v885_v27 = vmul.f32 1.442695, %v884_v29 }
 0x68d   : > { %1428 = vpow2.f32 %v885_v27  ;;  %v1510_v27 = vmov 43  }
 0x693   : > { %v1847_v31 = vpop.eup %1428 }
 0x694   : > { %888 = vrot.lane.b32.xlu2 %v1847_v31, %s1507_s26  ;;  %s1518_s26 = smov 2  }
 0x69c   : > { %1059 = vperm.xlu2 %1369, %v1754_v11  }
 0x6a4   : > { %1370 = vset.pattern.permute.xlu2 %v796_v26  ;;  %v1511_v26 = vmov 40  }
 0x6c2   : > { %v789_v34 = vpop.xlane.xlu0 %788 }
 0x6c3   : > { %v790_v28 = vadd.f32 1e-16, %v789_v34 }
 0x6c5   : > { %1430 = vrcp.f32 %v790_v28 }
 0x6cb   : > { %v1431_v35 = vpop.eup %1430 }
 0x6cc   : > { %v792_v30 = vmul.f32 %v1431_v35, %v1427_v21 }
 0x6ce   : > { %793 = vst.msk [vmem:[#allocation6] sm:$0x3] %vm604_vm10, %v792_v30  ;;  %v794_v36 = vperm.slane %v792_v30, 0  ;;  %v807_v37 = vperm.slane %v792_v30, 1 }
 0x6d0   : > { %805 = vperm.xlu0 %1368, %v794_v36   ;;  %812 = vperm.xlu2 %1370, %v807_v37  }
 0x6d8   : > { %v1049_v41 = vpop.xlane.xlu2 %1048  ;;  %1371 = vset.pattern.permute.xlu2 %v1852_v33  ;;  %1374 = vset.pattern.permute.xlu0 %v1508_v56 }
 0x6d9   : > { %v1050_v12 = vsub.f32 %v1046_v25, %v1049_v41 }
 0x6db   : > { %v1051_v40 = vmul.f32 1.442695, %v1050_v12 }
 0x6dd   : > { %1432 = vpow2.f32 %v1051_v40 }
 0x6e0   : > { %818 = vperm.xlu2 %1371, %v807_v37  }
 0x6e3   : > { %v1433_v42 = vpop.eup %1432 }
 0x6e4   : > { %v1053_v22 = vsel %vm604_vm10, %v1433_v42, 0.0 }
 0x6e5   : > { %1054 = vadd.xlane.f32.xlu1 %v1053_v22 }
 0x6e8   : > { %1372 = vset.pattern.permute.xlu2 %v1506_v19 }
 0x6e9   : > { %1064 = vperm.xlu2 %1372, %v728_v23  }
 0x6ee   : > { %v889_v43 = vpop.permute.xlu2 %888 }
 0x6ef   : > { %v891_v38 = vsel %vm548_vm7, %v889_v43, 0.0 }
 0x6f1   : > { %1373 = vset.pattern.permute.xlu2 %v1509_v58 }
 0x6f6   : > { %v1060_v44 = vpop.permute.xlu2 %1059 }
 0x6fe   : > { %799 = vperm.xlu1 %1367, %v794_v36  }
 0x728   : > { %892 = vadd.xlane.f32.xlu1 %v891_v38 }
 0x72a   : > { %v813_v45 = vpop.permute.xlu2 %812 }
 0x72b   : > { %v826_v4 = vmul.f32 %v813_v45, %v1646_v47 }
 0x72d   : > { %v837_v50 = vsel %vm362_vm3, %v826_v4, 0.0 }
 0x73a   : > { %v819_v46 = vpop.permute.xlu2 %818 }
 0x73b   : > { %v827_v55 = vmul.f32 %v819_v46, %v1648_v48 }
 0x73d   : > { %v838_v53 = vsel %vm362_vm3, %v827_v55, 0.0 }
 0x73e   : > { %v839_v61 = vadd.f32 %v838_v53, %v837_v50 }
 0x740   : > { %v840_v57 = vrot.slane %v839_v61, 4 }
 0x742   : > { %v806_v18 = vpop.permute.xlu0 %805  ;;  %v841_v21 = vadd.f32 %v840_v57, %v839_v61 }
 0x743   : > { %v1065_v5 = vpop.permute.xlu2 %1064  ;;  %v825_v48 = vmul.f32 %v806_v18, %v1681_v60 }
 0x744   : > { %v1067_v62 = vmul.f32 %v1065_v5, %v896_v63  ;;  %v842_v51 = vrot.slane %v841_v21, 2 }
 0x745   : > { %v829_v1 = vsel %vm362_vm3, %v825_v48, 0.0 }
 0x746   : > { %v843_v7 = vadd.f32 %v842_v51, %v841_v21 }
 0x748   : > { %v844_v14 = vrot.slane %v843_v7, 1 }
 0x74a   : > { %v845_v17 = vadd.f32 %v844_v14, %v843_v7  ;;  %v1154_v7 = vrot.slane %v1754_v11, 1 }
 0x758   : > { %v1055_v15 = vpop.xlane.xlu1 %1054 }
 0x759   : > { %1434 = vrcp.f32 %v1055_v15 }
 0x75f   : > { %v1435_v23 = vpop.eup %1434 }
 0x760   : > { %v1057_v59 = vmul.f32 %v1435_v23, %v1433_v42 }
 0x762   : > { %v1062_v10 = vmul.f32 %v1060_v44, %v1057_v59 }
 0x764   : > { %v1068_v32 = vadd.f32 %v1067_v62, %v1062_v10 }
 0x766   : > { %1073 = vrot.lane.b32.xlu2 %v1068_v32, %s1499_s21  ;;  %1070 = vrot.lane.b32.xlu0 %v1068_v32, %s1500_s22 }
 0x76e   : > { %1076 = vrot.lane.b32.xlu0 %v1068_v32, %s1498_s20  ;;  %s1252_s20 = sshll.u32 %s1517_s18, 4  ;;  %s1253_s20 = int_to_ptr.vmem [resolvable:$true] %s1252_s20 }
 0x770   : > { %v800_v0 = vpop.permute.xlu1 %799 }
 0x771   : > { %v824_v47 = vmul.f32 %v800_v0, %v1650_v49 }
 0x773   : > { %v828_v3 = vsel %vm362_vm3, %v824_v47, 0.0  ;;  %v1155_v47 = vperm.slane %v1754_v11, 0 }
 0x774   : > { %v830_v6 = vadd.f32 %v829_v1, %v828_v3 }
 0x776   : > { %v831_v24 = vrot.slane %v830_v6, 4 }
 0x778   : > { %v832_v8 = vadd.f32 %v831_v24, %v830_v6 }
 0x77a   : > { %v833_v9 = vrot.slane %v832_v8, 2 }
 0x77c   : > { %v834_v13 = vadd.f32 %v833_v9, %v832_v8 }
 0x77e   : > { %v835_v60 = vrot.slane %v834_v13, 1 }
 0x780   : > { %v836_v25 = vadd.f32 %v835_v60, %v834_v13  ;;  %v1156_v13 = vperm.slane %v1154_v7, 0 }
 0x782   : > { %v848_v49 = vsel %vm707_vm6, %v845_v17, %v836_v25 }
 0x783   : > { %850 = vst.msk [vmem:[#allocation5] sm:$0x3] %vm604_vm10, %v848_v49  ;;  %1299 = vmatmul.msk.f32.vlgmr.msra.gmra.mxu3 %vm362_vm3, %v848_v49 }
 0x79b   : > { %v893_v19 = vpop.xlane.xlu1 %892 }
 0x79c   : > { %1436 = vrcp.f32 %v893_v19  ;;  %v1189_v19 = vperm.slane %v1695_v2, 0 }
 0x7a2   : > { %v1437_v20 = vpop.eup %1436 }
 0x7a3   : > { %v895_v29 = vmul.f32 %v1437_v20, %v1847_v31 }
 0x7a5   : > { %1098 = vperm.xlu0 %1374, %v895_v29   ;;  %1088 = vperm.xlu2 %1373, %v895_v29  }
 0x7ad   : > { %1376 = vset.pattern.permute.xlu0 %v1510_v27  ;;  %1375 = vset.pattern.permute.xlu2 %v1511_v26 }
 0x7ae   : > { %1111 = vperm.xlu0 %1376, %v1829_v16   ;;  %1083 = vperm.xlu2 %1375, %v895_v29   ;;  %v1188_v29 = vrot.slane %v1695_v2, 1 }
 0x7b0   : > { %v1190_v26 = vperm.slane %v1188_v29, 0 }
 0x7b6   : > { %1377 = vset.pattern.permute.xlu0 %v1852_v33 }
 0x7c0   : > { %v1074_v28 = vpop.permute.xlu2 %1073 }
 0x7d8   : > { %v1071_v34 = vpop.permute.xlu0 %1070 }
 0x7d9   : > { %v1079_v30 = vsel %vm746_vm4, %v1071_v34, %v1074_v28 }
 0x7e0   : > { %v1077_v35 = vpop.permute.xlu0 %1076 }
 0x7e1   : > { %v1080_v36 = vsel %vm748_vm8, %v1079_v30, %v1077_v35 }
 0x7ff   : > { %v1089_v37 = vpop.permute.xlu2 %1088 }
 0x800   : > { %v1091_v31 = vmul.f32 %v1089_v37, %v1080_v36 }
 0x802   : > { %1093 = vrot.lane.b32.xlu1 %v1091_v31, %s1504_s25  ;;  %s1244_s25 = scalar_lea.vmem [#allocation8], %s1293_s19 }
 0x806   : > { %v872_v41 = vpop.f32.mrf.mxu3 }
 0x807   : > { %876 = vrot.lane.b32.xlu0 %v872_v41, %s1512_s11  ;;  %v1124_v41 = vld [vmem:[#allocation4] sm:$0xff] }
 0x808   : > { %v1084_v16 = vpop.permute.xlu2 %1083 }
 0x809   : > { %v1086_v42 = vmul.f32 %v1084_v16, %v1080_v36 }
 0x817   : > { %v1099_v12 = vpop.permute.xlu0 %1098 }
 0x818   : > { %v1101_v40 = vmul.f32 %v1099_v12, %v1080_v36 }
 0x81a   : > { %1103 = vrot.lane.b32.xlu2 %v1101_v40, %s1503_s23  ;;  %s1254_s23 = sshll.u32 %s1933_s10, 4  ;;  %s1255_s23 = int_to_ptr.hbm [resolvable:$true] %s1254_s23 }
 0x820   : > { %v1112_v52 = vpop.permute.xlu0 %1111 }
 0x874   : > { %v1094_v22 = vpop.permute.xlu1 %1093  ;;  %v1104_v38 = vpop.permute.xlu2 %1103 }
 0x875   : > { %v1096_v43 = vadd.f32 %v1094_v22, %v1086_v42  ;;  %v1126_v22 = vld [vmem:[#allocation4 + $0x10] sm:$0xff] }
 0x877   : > { %v1106_v44 = vadd.f32 %v1104_v38, %v1096_v43 }
 0x879   : > { %v1107_v45 = vmax.f32 %v1106_v44, 1e-30  ;;  %v877_v53 = vpop.permute.xlu0 %876 }
 0x87a   : > { %v879_v50 = vadd.f32 %v877_v53, %v1695_v2 }
 0x87b   : > { %1438 = vlog2.f32 %v1107_v45 }
 0x87c   : > { %v1300_v61 = vmul.f32 -1.442695, %v879_v50 }
 0x881   : > { %v1439_v46 = vpop.eup %1438 }
 0x882   : > { %v1109_v15 = vmul.f32 0.6931472, %v1439_v46  ;;  %v1125_v46 = vld [vmem:[#allocation4 + $0x8] sm:$0xff] }
 0x884   : > { %v1114_v54 = vmul.f32 %v1112_v52, %v1109_v15 }
 0x886   : > { %v1115_v23 = vmul.f32 1.442695, %v1114_v54 }
 0x888   : > { %1440 = vpow2.f32 %v1115_v23  ;;  %v1127_v23 = vld [vmem:[#allocation4 + $0x18] sm:$0xff] }
 0x88e   : > { %v1441_v63 = vpop.eup %1440 }
 0x88f   : > { %v1117_v5 = vsel %vm604_vm10, %v1441_v63, 0.0 }
 0x890   : > { %1118 = vadd.xlane.f32.xlu2 %v1117_v5 }
 0x903   : > { %v1119_v59 = vpop.xlane.xlu2 %1118 }
 0x904   : > { %v1120_v55 = vadd.f32 1e-16, %v1119_v59 }
 0x906   : > { %1442 = vrcp.f32 %v1120_v55 }
 0x907   : > { %1444 = vpow2.f32 %v1300_v61 }
 0x90c   : > { %v1443_v62 = vpop.eup %1442 }
 0x90d   : > { %v1122_v10 = vmul.f32 %v1443_v62, %v1441_v63  ;;  %v1445_v57 = vpop.eup %1444 }
 0x90e   : > { %v1224_v18 = vadd.f32 1.0, %v1445_v57 }
 0x90f   : > { %1123 = vst.msk [vmem:[#allocation7] sm:$0x3] %vm604_vm10, %v1122_v10  ;;  %v1128_v4 = vperm.slane %v1122_v10, 0  ;;  %v1141_v32 = vperm.slane %v1122_v10, 1 }
 0x910   : > { %1446 = vrcp.f32 %v1224_v18  ;;  %v1236_v9 = vand.u32 2147483648, %v1224_v18  ;;  %vm1230_vm5 = vweird.f32 %v1224_v18  ;;  %v1234_v14 = vand.u32 2147483647, %v1224_v18 }
 0x911   : > { %1139 = vperm.xlu0 %1377, %v1128_v4   ;;  %1133 = vperm.xlu1 %1367, %v1128_v4  }
 0x912   : > { %v1237_v17 = vor.u32 1.1754944e-38, %v1236_v9  ;;  %vm1235_vm7 = vcmp.eq.f32.partialorder %v1234_v14, 8.507059e+37 }
 0x916   : > { %v1447_v48 = vpop.eup %1446 }
 0x917   : > { %v1226_v21 = vmul.f32 %v1447_v48, %v1224_v18  ;;  %vm1231_vm10 = vweird.f32 %v1447_v48 }
 0x918   : > { %vm1232_vm6 = vmor %vm1230_vm5, %vm1231_vm10 }
 0x919   : > { %466 = vrot.lane.b32.xlu0 %v1629_v39, %s1513_s12  ;;  %1146 = vperm.xlu1 %1367, %v1141_v32   ;;  %v1227_v0 = vsub.f32 1.0, %v1226_v21 }
 0x91b   : > { %v1228_v6 = vmul.f32 %v1447_v48, %v1227_v0 }
 0x91d   : > { %v1229_v8 = vadd.f32 %v1447_v48, %v1228_v6 }
 0x91f   : > { %v1233_v25 = vsel %vm1232_vm6, %v1447_v48, %v1229_v8 }
 0x920   : > { %v1238_v49 = vsel %vm1235_vm7, %v1237_v17, %v1233_v25 }
 0x921   : > { %1378 = vset.pattern.permute.xlu1 %v1852_v33 }
 0x929   : > { %1152 = vperm.xlu1 %1378, %v1141_v32  }
 0x983   : > { %v1140_v1 = vpop.permute.xlu0 %1139  ;;  %v1134_v3 = vpop.permute.xlu1 %1133 }
 0x984   : > { %v1160_v39 = vmul.f32 %v1155_v47, %v1140_v1  ;;  %v1159_v51 = vmul.f32 %v1155_v47, %v1134_v3  ;;  %v1193_v20 = vmul.f32 %v1189_v19, %v1134_v3  ;;  %v1194_v30 = vmul.f32 %v1189_v19, %v1140_v1 }
 0x986   : > { %v1164_v33 = vsub.f32 1.0, %v1160_v39  ;;  %v1163_v24 = vsub.f32 1.0, %v1159_v51 }
 0x988   : > { %1173 = vrot.lane.b32.xlu2 %v1164_v33, %s1514_s15  ;;  %1171 = vrot.lane.b32.xlu1 %v1163_v24, %s1514_s15 }
 0x98b   : > { %v467_v56 = vpop.permute.xlu0 %466  ;;  %v1147_v58 = vpop.permute.xlu1 %1146 }
 0x98c   : > { %469 = vst.msk [vmem:[#allocation3] sm:$0x3] %vm463_vm9, %v467_v56  ;;  %v1161_v60 = vmul.f32 %v1156_v13, %v1147_v58  ;;  %v1195_v28 = vmul.f32 %v1190_v26, %v1147_v58  ;;  %vm1245_vm9 = vcmask 58368  }
 0x98e   : > { %v1165_v11 = vsub.f32 1.0, %v1161_v60 }
 0x990   : > { %1241 = vrot.lane.b32.xlu2 %v1238_v49, %s1515_s16  ;;  %1175 = vrot.lane.b32.xlu0 %v1165_v11, %s1514_s15 }
 0x998   : > { %1201 = vrot.lane.b32.xlu0 %v1193_v20, %s1516_s17 }
 0x99b   : > { %v1153_v27 = vpop.permute.xlu1 %1152 }
 0x99c   : > { %v1162_v34 = vmul.f32 %v1156_v13, %v1153_v27  ;;  %v1196_v36 = vmul.f32 %v1190_v26, %v1153_v27 }
 0x99e   : > { %v1166_v35 = vsub.f32 1.0, %v1162_v34 }
 0x9a0   : > { %1205 = vrot.lane.b32.xlu0 %v1195_v28, %s1516_s17  ;;  %1177 = vrot.lane.b32.xlu1 %v1166_v35, %s1514_s15 }
 0x9a8   : > { %1203 = vrot.lane.b32.xlu1 %v1194_v30, %s1516_s17 }
 0x9b0   : > { %1207 = vrot.lane.b32.xlu1 %v1196_v36, %s1516_s17 }
 0x9e2   : > { %v1174_v37 = vpop.permute.xlu2 %1173 }
 0x9e3   : > { %v1184_v15 = vmul.f32 %v1174_v37, %v1125_v46 }
 0x9ea   : > { %v1242_v2 = vpop.permute.xlu2 %1241 }
 0x9eb   : > { %1246 = vst.msk [vmem:[%s1244_s25] sm:$0x3] %vm1245_vm9, %v1242_v2 }
 0x9ec   : > { %1306 = dma.vmem_to_hbm [thread:$0]  (%p1309_p4), %s1253_s20, 256, %s1255_s23, [#allocation9], %s1490_s24, %s1490_s24, %s1518_s26  }
 0x9fa   : > { %v1172_v12 = vpop.permute.xlu1 %1171 }
 0x9fb   : > { %v1183_v40 = vmul.f32 %v1172_v12, %v1124_v41 }
 0xa02   : > { %v1176_v31 = vpop.permute.xlu0 %1175 }
 0xa03   : > { %v1185_v43 = vmul.f32 %v1176_v31, %v1126_v22 }
 0xa0a   : > { %v1202_v16 = vpop.permute.xlu0 %1201 }
 0xa0b   : > { %v1213_v42 = vadd.f32 %v1202_v16, %v1183_v40 }
 0xa0d   : > { %1217 = vst.msk [vmem:[#allocation4] sm:$0xff] %vm362_vm3, %v1213_v42 }
 0xa12   : > { %v1206_v38 = vpop.permute.xlu0 %1205  ;;  %v1178_v44 = vpop.permute.xlu1 %1177 }
 0xa13   : > { %v1215_v45 = vadd.f32 %v1206_v38, %v1185_v43  ;;  %v1186_v63 = vmul.f32 %v1178_v44, %v1127_v23 }
 0xa15   : > { %1219 = vst.msk [vmem:[#allocation4 + $0x10] sm:$0xff] %vm362_vm3, %v1215_v45 }
 0xa1a   : > { %v1204_v52 = vpop.permute.xlu1 %1203 }
 0xa1b   : > { %v1214_v54 = vadd.f32 %v1204_v52, %v1184_v15 }
 0xa1d   : > { %1218 = vst.msk [vmem:[#allocation4 + $0x8] sm:$0xff] %vm362_vm3, %v1214_v54 }
 0xa22   : > { %v1208_v5 = vpop.permute.xlu1 %1207 }
 0xa23   : > { %v1216_v59 = vadd.f32 %v1208_v5, %v1186_v63 }
 0xa25   : > { %1220 = vst.msk [vmem:[#allocation4 + $0x18] sm:$0xff] %vm362_vm3, %v1216_v59 }
 0xa26   : > { %1481 = dma.done.wait (%p1309_p4), [#allocation9], 256  }
 0xa27   : > { %1483 = vsyncadd (%p1309_p4), [#allocation9], 4294967040 }
 0xa28 PF: > { %s21_s13 = sadd.s32 1, %s1486_s13  }
 0xa29   : > { %p18_p5 = scmp.ge.s32.totalorder %s21_s13, 10  }
 0xa2b   :  { %20 = sbr.rel (!%p18_p5) target bundleno = 1 (0x1), region = 90 }
 0xa30   :  { %1271 = vsyncpa [#allocation9], 1 }
 0xa31   :  { %1273 = vsyncpa [#allocation9 + $0x1], 1 }

</bundles_post_ra>
